<compile_context>
chip_gen: v5e
topology: v5e:2x2
jax: 0.10.0
libtpu: 0.0.40
codegen_flags: <defaults>
</compile_context>

<pallas_src>
import numpy as np
import jax
import jax.numpy as jnp
from jax.experimental import pallas as pl
from jax.experimental.pallas import tpu as pltpu


def embed2graph_kernel(x_ref, wcat_ref, b1_ref, w2_ref, b2_ref, out_ref):
    TB, R, D = x_ref.shape

    # (TB, R, D) -> (TB*R, D): fills the MXU sublanes across the batch tile.
    xb = x_ref[...].reshape(TB * R, D)

    # Single fused MXU matmul against [W1_send^T | W1_recv^T]  -> (TB*R, 2D).
    hw = jnp.dot(xb, wcat_ref[...], preferred_element_type=jnp.float32)

    send = hw[:, :D].reshape(TB, R, D)                       # indexed by sender j
    # Fold fc_out bias here: an (R, D) add instead of an (R, R, D) add.
    recv = (hw[:, D:] + b1_ref[...]).reshape(TB, R, D)       # indexed by receiver i

    # h[b, i, j, :] = relu( W1_s x[b, j] + W1_r x[b, i] + b1 )
    h = jnp.maximum(send[:, None, :, :] + recv[:, :, None, :], 0.0)   # (TB, R, R, D)

    # fc_cat as an MXU reduction over D (instead of VALU mul + XLU lane reduce).
    score = jnp.dot(h.reshape(TB * R * R, D), w2_ref[...],
                    preferred_element_type=jnp.float32)      # (TB*R*R, 1)

    # Lane-dense store: (TB, R*R) with last dim = R*R (256 here).
    score = score.reshape(TB, R * R) + b2_ref[0]             # b2 scalar from SMEM
    out_ref[...] = jnp.maximum(score, 0.0)


def embed2graph_forward(x, W1, b1, W2, b2):
    """x: (B, R, D); W1: (D, 2D); b1: (D,); W2: (1, D); b2: (1,). Returns (B, R, R, 1)."""
    B, R, D = x.shape

    # Fused fc_out weight: [sender half | receiver half], pre-transposed for x @ W^T.
    w_cat = jnp.concatenate(
        [jnp.asarray(W1[:, :D], jnp.float32).T,
         jnp.asarray(W1[:, D:], jnp.float32).T], axis=1)     # (D, 2D)
    b1_2d = jnp.asarray(b1, jnp.float32).reshape(1, D)
    w2_col = jnp.asarray(W2, jnp.float32).reshape(1, D).T    # (D, 1)  (fc_cat weight^T)
    b2_1d = jnp.asarray(b2, jnp.float32).reshape(1)          # SMEM scalar

    # Batch tile: aim for TB*R >= 128 rows per MXU pass, TB must divide B.
    TB = min(B, max(1, pl.cdiv(128, R)))
    while B % TB:
        TB -= 1
    NB = B // TB

    out = pl.pallas_call(
        embed2graph_kernel,
        out_shape=jax.ShapeDtypeStruct((B, R * R), jnp.float32),
        grid=(NB,),
        in_specs=[
            pl.BlockSpec((TB, R, D), lambda g: (g, 0, 0)),        # x, per batch-group
            pl.BlockSpec((D, 2 * D), lambda g: (0, 0)),           # fused fc_out weight^T
            pl.BlockSpec((1, D), lambda g: (0, 0)),               # fc_out bias
            pl.BlockSpec((D, 1), lambda g: (0, 0)),               # fc_cat weight^T (column)
            pl.BlockSpec(memory_space=pltpu.MemorySpace.SMEM),    # fc_cat bias (scalar)
        ],
        out_specs=pl.BlockSpec((TB, R * R), lambda g: (g, 0)),    # lane-dense output
        compiler_params=pltpu.CompilerParams(
            dimension_semantics=("parallel",)),
    )(x.astype(jnp.float32), w_cat, b1_2d, w2_col, b2_1d)

    return out.reshape(B, R, R, 1)


def reference_forward(x, W1, b1, W2, b2):
    """Literal JAX port of the PyTorch forward (builds the one-hot matrices)."""
    B, R, D = x.shape
    off_diag = np.ones([R, R])
    idx_rec = np.where(off_diag)[0]      # receiver index i per pair
    idx_send = np.where(off_diag)[1]     # sender index j per pair
    rel_rec = jnp.asarray(np.eye(R, dtype=np.float32)[idx_rec])    # (R*R, R)
    rel_send = jnp.asarray(np.eye(R, dtype=np.float32)[idx_send])  # (R*R, R)

    receivers = jnp.einsum('pr,brd->bpd', rel_rec, x)
    senders = jnp.einsum('pr,brd->bpd', rel_send, x)
    xc = jnp.concatenate([senders, receivers], axis=2)             # (B, R*R, 2D)
    h = jax.nn.relu(xc @ W1.T + b1)                                # fc_out + relu
    s = jax.nn.relu(h @ W2.T + b2)                                 # fc_cat + relu
    return s.reshape(B, R, R, -1)


if __name__ == "__main__":
    B, R, D = 2, 16, 32                      # batch, roi_num, input_dim (small synthetic)

    key = jax.random.PRNGKey(0)
    k_x, k_w1, k_b1, k_w2, k_b2 = jax.random.split(key, 5)

    # Deterministic PyTorch-style Linear init: U(-1/sqrt(fan_in), 1/sqrt(fan_in)).
    bound1 = 1.0 / np.sqrt(2 * D)
    W1 = jax.random.uniform(k_w1, (D, 2 * D), jnp.float32, -bound1, bound1)  # fc_out.weight
    b1 = jax.random.uniform(k_b1, (D,), jnp.float32, -bound1, bound1)        # fc_out.bias
    bound2 = 1.0 / np.sqrt(D)
    W2 = jax.random.uniform(k_w2, (1, D), jnp.float32, -bound2, bound2)      # fc_cat.weight
    b2 = jax.random.uniform(k_b2, (1,), jnp.float32, -bound2, bound2)        # fc_cat.bias

    x = jax.random.normal(k_x, (B, R, D), jnp.float32)

    out = embed2graph_forward(x, W1, b1, W2, b2)
    out = jax.block_until_ready(out)

    ref = reference_forward(x, W1, b1, W2, b2)
    np.testing.assert_allclose(np.asarray(out), np.asarray(ref), rtol=1e-4, atol=2e-5)
    assert out.shape == (B, R, R, 1)

    print("KERNEL_OK")
</pallas_src>

<mosaic_0001>
module attributes {stable_mosaic.version = 11 : i64} {
  func.func @embed2graph_kernel(%arg0: i32, %arg1: memref<2x16x32xf32, #tpu.memory_space<vmem>>, %arg2: memref<32x64xf32, #tpu.memory_space<vmem>>, %arg3: memref<1x32xf32, #tpu.memory_space<vmem>>, %arg4: memref<32x1xf32, #tpu.memory_space<vmem>>, %arg5: memref<1xf32, #tpu.memory_space<smem>>, %arg6: memref<2x256xf32, #tpu.memory_space<vmem>>) attributes {dimension_semantics = [#tpu.dimension_semantics<parallel>], iteration_bounds = array<i64: 1>, scalar_prefetch = 0 : i64, scratch_operands = 0 : i64, tpu.core_type = #tpu.core_type<tc>, window_params = [{transform_indices = @transform_0, window_bounds = array<i64: 2, 16, 32>}, {pipeline_mode = #tpu.pipeline_mode<synchronous>, transform_indices = @transform_1, window_bounds = array<i64: 32, 64>}, {pipeline_mode = #tpu.pipeline_mode<synchronous>, transform_indices = @transform_2, window_bounds = array<i64: 1, 32>}, {pipeline_mode = #tpu.pipeline_mode<synchronous>, transform_indices = @transform_3, window_bounds = array<i64: 32, 1>}, {transform_indices = @transform_4, window_bounds = array<i64: 1>}, {transform_indices = @transform_5, window_bounds = array<i64: 2, 256>}]} {
    %c0 = arith.constant 0 : index
    %c0_0 = arith.constant 0 : index
    %c0_1 = arith.constant 0 : index
    %0 = vector.load %arg1[%c0, %c0_0, %c0_1] : memref<2x16x32xf32, #tpu.memory_space<vmem>>, vector<2x16x32xf32>
    %1 = vector.shape_cast %0 : vector<2x16x32xf32> to vector<32x32xf32>
    %c0_2 = arith.constant 0 : index
    %c0_3 = arith.constant 0 : index
    %2 = vector.load %arg2[%c0_2, %c0_3] : memref<32x64xf32, #tpu.memory_space<vmem>>, vector<32x64xf32>
    %cst = arith.constant dense<0.000000e+00> : vector<32x64xf32>
    %3 = tpu.matmul %1, %2, %cst {dimension_numbers = #tpu.dot_dimension_numbers<[1], [0], [0], [1], [0, 0, 1, 1], [], []>} : vector<32x32xf32>, vector<32x64xf32>, vector<32x64xf32> -> vector<32x64xf32>
    %4 = vector.extract_strided_slice %3 {offsets = [0, 0], sizes = [32, 32], strides = [1, 1]} : vector<32x64xf32> to vector<32x32xf32>
    %5 = vector.shape_cast %4 : vector<32x32xf32> to vector<2x16x32xf32>
    %6 = vector.extract_strided_slice %3 {offsets = [0, 32], sizes = [32, 32], strides = [1, 1]} : vector<32x64xf32> to vector<32x32xf32>
    %c0_4 = arith.constant 0 : index
    %c0_5 = arith.constant 0 : index
    %7 = vector.load %arg3[%c0_4, %c0_5] : memref<1x32xf32, #tpu.memory_space<vmem>>, vector<1x32xf32>
    %8 = vector.broadcast %7 : vector<1x32xf32> to vector<32x32xf32>
    %9 = arith.addf %6, %8 : vector<32x32xf32>
    %10 = vector.shape_cast %9 : vector<32x32xf32> to vector<2x16x32xf32>
    %11 = vector.shape_cast %5 : vector<2x16x32xf32> to vector<2x1x16x32xf32>
    %12 = vector.shape_cast %10 : vector<2x16x32xf32> to vector<2x16x1x32xf32>
    %13 = vector.broadcast %11 : vector<2x1x16x32xf32> to vector<2x16x16x32xf32>
    %14 = vector.broadcast %12 : vector<2x16x1x32xf32> to vector<2x16x16x32xf32>
    %15 = arith.addf %13, %14 : vector<2x16x16x32xf32>
    %cst_6 = arith.constant 0.000000e+00 : f32
    %16 = vector.broadcast %cst_6 : f32 to vector<2x16x16x32xf32>
    %17 = arith.maximumf %15, %16 : vector<2x16x16x32xf32>
    %18 = vector.shape_cast %17 : vector<2x16x16x32xf32> to vector<512x32xf32>
    %c0_7 = arith.constant 0 : index
    %c0_8 = arith.constant 0 : index
    %19 = vector.load %arg4[%c0_7, %c0_8] : memref<32x1xf32, #tpu.memory_space<vmem>>, vector<32x1xf32>
    %cst_9 = arith.constant dense<0.000000e+00> : vector<512x1xf32>
    %20 = tpu.matmul %18, %19, %cst_9 {dimension_numbers = #tpu.dot_dimension_numbers<[1], [0], [0], [1], [0, 0, 1, 1], [], []>} : vector<512x32xf32>, vector<32x1xf32>, vector<512x1xf32> -> vector<512x1xf32>
    %21 = vector.shape_cast %20 : vector<512x1xf32> to vector<2x256xf32>
    %c0_10 = arith.constant 0 : index
    %22 = memref.load %arg5[%c0_10] : memref<1xf32, #tpu.memory_space<smem>>
    %23 = vector.broadcast %22 : f32 to vector<2x256xf32>
    %24 = arith.addf %21, %23 : vector<2x256xf32>
    %cst_11 = arith.constant 0.000000e+00 : f32
    %25 = vector.broadcast %cst_11 : f32 to vector<2x256xf32>
    %26 = arith.maximumf %24, %25 : vector<2x256xf32>
    %c0_12 = arith.constant 0 : index
    %c0_13 = arith.constant 0 : index
    %27 = vector.load %arg6[%c0_12, %c0_13] : memref<2x256xf32, #tpu.memory_space<vmem>>, vector<2x256xf32>
    tpu.vector_store %arg6[%c0_12, %c0_13], %26 {strides = array<i32>} : memref<2x256xf32, #tpu.memory_space<vmem>>, vector<2x256xf32>,
    return
  }
  func.func @transform_0(%arg0: i32) -> (i32, i32, i32) {
    %c0_i32 = arith.constant 0 : i32
    %c0_i32_0 = arith.constant 0 : i32
    %c0_i32_1 = arith.constant 0 : i32
    return %arg0, %c0_i32, %c0_i32_0 : i32, i32, i32
  }
  func.func @transform_1(%arg0: i32) -> (i32, i32) {
    %c0_i32 = arith.constant 0 : i32
    %c0_i32_0 = arith.constant 0 : i32
    %c0_i32_1 = arith.constant 0 : i32
    return %c0_i32, %c0_i32_0 : i32, i32
  }
  func.func @transform_2(%arg0: i32) -> (i32, i32) {
    %c0_i32 = arith.constant 0 : i32
    %c0_i32_0 = arith.constant 0 : i32
    %c0_i32_1 = arith.constant 0 : i32
    return %c0_i32, %c0_i32_0 : i32, i32
  }
  func.func @transform_3(%arg0: i32) -> (i32, i32) {
    %c0_i32 = arith.constant 0 : i32
    %c0_i32_0 = arith.constant 0 : i32
    %c0_i32_1 = arith.constant 0 : i32
    return %c0_i32, %c0_i32_0 : i32, i32
  }
  func.func @transform_4(%arg0: i32) -> i32 {
    %c0_i32 = arith.constant 0 : i32
    %c0_i32_0 = arith.constant 0 : i32
    return %c0_i32 : i32
  }
  func.func @transform_5(%arg0: i32) -> (i32, i32) {
    %c0_i32 = arith.constant 0 : i32
    %c0_i32_0 = arith.constant 0 : i32
    return %arg0, %c0_i32 : i32, i32
  }
}

</mosaic_0001>

<bundles_post_ra>
// kernel: tpu_custom_call.1
= control target key start
LH: loop header
LB: loop body
LE: loop exit
PB: predicated region body
PF: predicated region fallthrough
CT: control target
= control target key end

     0   :  { %11 = vsyncpa [#allocation4], 0  ;;  %s2693_s0 = inlined_call_operand.vmem [shape: f32[2,16,32], index: 0, kind: input, shape index: {}]   ;;  %s2694_s1 = inlined_call_operand.hbm [shape: f32[32,64], index: 1, kind: input, shape index: {}]   ;;  %s2695_s2 = inlined_call_operand.vmem [shape: f32[1,32], index: 2, kind: input, shape index: {}]   ;;  %s2696_s3 = inlined_call_operand.vmem [shape: f32[32,1], index: 3, kind: input, shape index: {}]   ;;  %s2697_s4 = inlined_call_operand.<no memory space> [shape: f32[1], index: 4, kind: input, shape index: {}]   ;;  %s2698_s5 = inlined_call_operand.hbm [shape: f32[2,256], index: 5, kind: output, shape index: {}]  }
   0x1   :  { %12 = vsyncpa [#allocation5], 0  ;;  %s19_s20 = sshll.u32 %s2694_s1, 4  ;;  %s2020_s21 = smov [#allocation3]   ;;  %s20_s20 = int_to_ptr.hbm [resolvable:$true] %s19_s20 }
   0x2   :  { %s21_s22 = sshll.u32 %s2020_s21, 4  ;;  %s2021_s23 = smov 128   ;;  %s22_s22 = int_to_ptr.vmem [resolvable:$true] %s21_s22 }
   0x3   :  { %s2022_s24 = smov 8  }
   0x4   :  { %27 = dma.hbm_to_vmem [thread:$0]  %s20_s20, 512, %s22_s22, [#allocation4], %s2021_s23, %s2021_s23, %s2022_s24  }
   0x5   :  { %2016 = dma.done.wait [#allocation4], 512  }
   0x6   :  { %2017 = vsyncadd [#allocation4], 4294966784  ;;  %v45_v0 = vld [vmem:[#allocation3 + $0x18] sm:$0xff]  ;;  %v44_v1 = vld [vmem:[#allocation3 + $0x10] sm:$0xff]  ;;  %s2023_s1 = smov 32   ;;  %vm46_vm0 = vcmask 261120  }
   0x7   :  { %71 = vmatpush.msra.mxu0 %v45_v0  ;;  %v43_v2 = vld [vmem:[#allocation3 + $0x8] sm:$0xff]  ;;  %v1967_v3 = vld [vmem:[%s2695_s2] ss:$0 sm:$0xff]  ;;  %v42_v4 = vld [vmem:[#allocation3] sm:$0xff]  ;;  %s2024_s9 = smov 96   ;;  %vm1701_vm1 = vcmask 130112  }
   0x8   :  { %91 = vrot.lane.b32.xlu0 %v1967_v3, %s2023_s1  ;;  %v38_v5 = vld [vmem:[%s2693_s0] sm:$0xff]  ;;  %v39_v6 = vld [vmem:[%s2693_s0 + $0x8] sm:$0xff]  ;;  %v40_v7 = vld [vmem:[%s2693_s0 + $0x10] sm:$0xff]  ;;  %vm1705_vm2 = vcmask 195712   ;;  %vm1709_vm3 = vcmask 261312   ;;  %vm1713_vm4 = vcmask 326912  }
   0x9   :  { %72 = vmatpush.msra.mxu0 %v44_v1  ;;  %v41_v8 = vld [vmem:[%s2693_s0 + $0x18] sm:$0xff]  ;;  %v388_v57 = vld [vmem:[%s2696_s3 + $0x10] sm:$0xff]  ;;  %vm1717_vm5 = vcmask 392512   ;;  %vm1721_vm6 = vcmask 458112   ;;  %vm1725_vm7 = vcmask 523712   ;;  %vm1729_vm8 = vcmask 589312  }
   0xa   :  { %v389_v56 = vld [vmem:[%s2696_s3 + $0x18] sm:$0xff]  ;;  %vm1733_vm9 = vcmask 654912   ;;  %vm1737_vm10 = vcmask 720512   ;;  %vm1741_vm11 = vcmask 786112   ;;  %vm1745_vm12 = vcmask 851712   ;;  %s1867_s21 = sshll.u32 %s2698_s5, 4  ;;  %s1868_s21 = int_to_ptr.hbm [resolvable:$true] %s1867_s21 }
   0xb   :  { %73 = vmatpush.msra.mxu0 %v43_v2  ;;  %1945 = vmatpush.msra.mxu1 %v389_v56  ;;  %vm1749_vm13 = vcmask 917312   ;;  %vm1753_vm14 = vcmask 982912   ;;  %vm1757_vm15 = vcmask 1048512  }
   0xc   :  { %1946 = vmatpush.msra.mxu2 %v389_v56  ;;  %1947 = vmatpush.msra.mxu3 %v389_v56 }
   0xd   :  { %74 = vmatpush.msra.mxu0 %v42_v4  ;;  %1948 = vmatpush.msra.mxu1 %v388_v57  ;;  %v387_v4 = vld [vmem:[%s2696_s3 + $0x8] sm:$0xff] }
   0xe   :  { %1877 = vmatmul.msk.f32.vlgmr.msra.gmra.mxu0 %vm46_vm0, %v38_v5  ;;  %1949 = vmatpush.msra.mxu2 %v388_v57  ;;  %v386_v5 = vld [vmem:[%s2696_s3] sm:$0xff] }
   0xf   :  { %594 = vmatpush.msrb.mxu0 %v389_v56  ;;  %1950 = vmatpush.msra.mxu3 %v388_v57 }
  0x10   :  { %1951 = vmatpush.msra.mxu1 %v387_v4  ;;  %1952 = vmatpush.msra.mxu2 %v387_v4 }
  0x11   :  { %595 = vmatpush.msrb.mxu0 %v388_v57  ;;  %1953 = vmatpush.msra.mxu3 %v387_v4 }
  0x12   :  { %1954 = vmatpush.msra.mxu1 %v386_v5  ;;  %1955 = vmatpush.msra.mxu2 %v386_v5 }
  0x13   :  { %596 = vmatpush.msrb.mxu0 %v387_v4  ;;  %1956 = vmatpush.msra.mxu3 %v386_v5 }
  0x15   :  { %597 = vmatpush.msrb.mxu0 %v386_v5 }
  0x16   :  { %1878 = vmatmul.msk.f32.gmra.mxu0 %vm46_vm0, %v39_v6 }
  0x1e   :  { %1879 = vmatmul.msk.f32.gmra.mxu0 %vm46_vm0, %v40_v7 }
  0x26   :  { %1880 = vmatmul.msk.f32.gmra.mxu0 %vm46_vm0, %v41_v8 }
  0x7a   :  { %v2079_v9 = vpop.permute.xlu0 %91 }
  0x8b   :  { %v2081_v10 = vpop.f32.mrf.mxu0 }
  0x8c   :  { %v94_v11 = vadd.f32 %v2079_v9, %v2081_v10 }
  0x8e   :  { %v130_v12 = vperm.slane %v94_v11, 0  ;;  %v107_v13 = vrot.slane %v94_v11, 6  ;;  %v102_v14 = vrot.slane %v94_v11, 1  ;;  %v104_v17 = vrot.slane %v94_v11, 3 }
  0x8f   :  { %v108_v18 = vrot.slane %v94_v11, 7  ;;  %v103_v19 = vrot.slane %v94_v11, 2  ;;  %v106_v24 = vrot.slane %v94_v11, 5  ;;  %v105_v25 = vrot.slane %v94_v11, 4 }
  0x90   :  { %162 = vrot.lane.b32.xlu0 %v130_v12, %s2024_s9  ;;  %v136_v15 = vperm.slane %v107_v13, 0  ;;  %v131_v16 = vperm.slane %v102_v14, 0  ;;  %v133_v20 = vperm.slane %v104_v17, 0 }
  0x91   :  { %v137_v21 = vperm.slane %v108_v18, 0  ;;  %v132_v22 = vperm.slane %v103_v19, 0  ;;  %v135_v27 = vperm.slane %v106_v24, 0  ;;  %v134_v28 = vperm.slane %v105_v25, 0 }
  0x92   :  { %174 = vrot.lane.b32.xlu2 %v136_v15, %s2024_s9  ;;  %164 = vrot.lane.b32.xlu1 %v131_v16, %s2024_s9 }
  0x93   :  { %v2089_v23 = vpop.f32.mrf.mxu0 }
  0x94   :  { %v95_v26 = vadd.f32 %v2079_v9, %v2089_v23 }
  0x96   :  { %v138_v29 = vperm.slane %v95_v26, 0  ;;  %v111_v30 = vrot.slane %v95_v26, 3  ;;  %v110_v31 = vrot.slane %v95_v26, 2  ;;  %v109_v32 = vrot.slane %v95_v26, 1 }
  0x97   :  { %v114_v36 = vrot.slane %v95_v26, 6  ;;  %v113_v38 = vrot.slane %v95_v26, 5  ;;  %v112_v39 = vrot.slane %v95_v26, 4  ;;  %v115_v45 = vrot.slane %v95_v26, 7 }
  0x98   :  { %168 = vrot.lane.b32.xlu0 %v133_v20, %s2024_s9  ;;  %v141_v33 = vperm.slane %v111_v30, 0  ;;  %v140_v34 = vperm.slane %v110_v31, 0  ;;  %v139_v35 = vperm.slane %v109_v32, 0 }
  0x99   :  { %v144_v40 = vperm.slane %v114_v36, 0  ;;  %v143_v42 = vperm.slane %v113_v38, 0  ;;  %v142_v43 = vperm.slane %v112_v39, 0  ;;  %v145_v47 = vperm.slane %v115_v45, 0 }
  0x9a   :  { %176 = vrot.lane.b32.xlu2 %v137_v21, %s2024_s9  ;;  %166 = vrot.lane.b32.xlu1 %v132_v22, %s2024_s9 }
  0x9b   :  { %v2101_v37 = vpop.f32.mrf.mxu0 }
  0x9c   :  { %v96_v41 = vadd.f32 %v2079_v9, %v2101_v37 }
  0x9e   :  { %v116_v44 = vrot.slane %v96_v41, 1  ;;  %v146_v48 = vperm.slane %v96_v41, 0  ;;  %v119_v49 = vrot.slane %v96_v41, 4  ;;  %v118_v50 = vrot.slane %v96_v41, 3 }
  0x9f   :  { %v117_v51 = vrot.slane %v96_v41, 2  ;;  %v122_v55 = vrot.slane %v96_v41, 7  ;;  %v121_v59 = vrot.slane %v96_v41, 6  ;;  %v120_v60 = vrot.slane %v96_v41, 5 }
  0xa0   :  { %172 = vrot.lane.b32.xlu0 %v135_v27, %s2024_s9  ;;  %v147_v46 = vperm.slane %v116_v44, 0  ;;  %v150_v52 = vperm.slane %v119_v49, 0  ;;  %v149_v53 = vperm.slane %v118_v50, 0 }
  0xa1   :  { %v148_v54 = vperm.slane %v117_v51, 0  ;;  %v153_v61 = vperm.slane %v122_v55, 0  ;;  %v152_v63 = vperm.slane %v121_v59, 0  ;;  %v151_v0 = vperm.slane %v120_v60, 0 }
  0xa2   :  { %170 = vrot.lane.b32.xlu2 %v134_v28, %s2024_s9  ;;  %178 = vrot.lane.b32.xlu1 %v138_v29, %s2024_s9 }
  0xa3   :  { %v2120_v58 = vpop.f32.mrf.mxu0 }
  0xa4   :  { %v97_v62 = vadd.f32 %v2079_v9, %v2120_v58 }
  0xa6   :  { %v124_v1 = vrot.slane %v97_v62, 2  ;;  %v123_v2 = vrot.slane %v97_v62, 1  ;;  %v154_v6 = vperm.slane %v97_v62, 0  ;;  %v127_v8 = vrot.slane %v97_v62, 5 }
  0xa7   :  { %v125_v9 = vrot.slane %v97_v62, 3  ;;  %v126_v11 = vrot.slane %v97_v62, 4  ;;  %v128_v15 = vrot.slane %v97_v62, 6  ;;  %v129_v16 = vrot.slane %v97_v62, 7 }
  0xa8   :  { %184 = vrot.lane.b32.xlu0 %v141_v33, %s2024_s9  ;;  %v156_v3 = vperm.slane %v124_v1, 0  ;;  %v155_v7 = vperm.slane %v123_v2, 0  ;;  %v159_v12 = vperm.slane %v127_v8, 0 }
  0xa9   :  { %v157_v13 = vperm.slane %v125_v9, 0  ;;  %v158_v14 = vperm.slane %v126_v11, 0  ;;  %v160_v17 = vperm.slane %v128_v15, 0  ;;  %v161_v18 = vperm.slane %v129_v16, 0 }
  0xaa   :  { %182 = vrot.lane.b32.xlu2 %v140_v34, %s2024_s9  ;;  %180 = vrot.lane.b32.xlu1 %v139_v35, %s2024_s9 }
  0xb0   :  { %190 = vrot.lane.b32.xlu0 %v144_v40, %s2024_s9 }
  0xb2   :  { %188 = vrot.lane.b32.xlu2 %v143_v42, %s2024_s9  ;;  %186 = vrot.lane.b32.xlu1 %v142_v43, %s2024_s9 }
  0xb8   :  { %196 = vrot.lane.b32.xlu0 %v147_v46, %s2024_s9 }
  0xba   :  { %192 = vrot.lane.b32.xlu1 %v145_v47, %s2024_s9  ;;  %194 = vrot.lane.b32.xlu2 %v146_v48, %s2024_s9 }
  0xc0   :  { %202 = vrot.lane.b32.xlu0 %v150_v52, %s2024_s9 }
  0xc2   :  { %200 = vrot.lane.b32.xlu2 %v149_v53, %s2024_s9  ;;  %198 = vrot.lane.b32.xlu1 %v148_v54, %s2024_s9 }
  0xc8   :  { %208 = vrot.lane.b32.xlu0 %v153_v61, %s2024_s9 }
  0xca   :  { %206 = vrot.lane.b32.xlu2 %v152_v63, %s2024_s9  ;;  %204 = vrot.lane.b32.xlu1 %v151_v0, %s2024_s9 }
  0xd0   :  { %214 = vrot.lane.b32.xlu0 %v156_v3, %s2024_s9 }
  0xd2   :  { %210 = vrot.lane.b32.xlu1 %v154_v6, %s2024_s9  ;;  %212 = vrot.lane.b32.xlu2 %v155_v7, %s2024_s9 }
  0xd8   :  { %220 = vrot.lane.b32.xlu0 %v159_v12, %s2024_s9 }
  0xda   :  { %216 = vrot.lane.b32.xlu1 %v157_v13, %s2024_s9  ;;  %218 = vrot.lane.b32.xlu2 %v158_v14, %s2024_s9 }
  0xe2   :  { %222 = vrot.lane.b32.xlu1 %v160_v17, %s2024_s9  ;;  %224 = vrot.lane.b32.xlu2 %v161_v18, %s2024_s9 }
  0xec   :  { %v2141_v19 = vpop.permute.xlu2 %174 }
  0xed   :  { %v271_v20 = vadd.f32 %v2141_v19, %v2089_v23 }
  0xef   :  { %v335_v21 = vmax.f32 %v271_v20, 0.0 }
  0xf1   :  { %1894 = vmatmul.msk.f32.vlgmr.msra.gmra.mxu1 %vm46_vm0, %v335_v21 }
  0xf4   :  { %v177_v22 = vpop.permute.xlu2 %176 }
  0xf5   :  { %v272_v24 = vadd.f32 %v177_v22, %v2081_v10  ;;  %v273_v26 = vadd.f32 %v177_v22, %v2089_v23 }
  0xf7   :  { %v336_v25 = vmax.f32 %v272_v24, 0.0  ;;  %v337_v27 = vmax.f32 %v273_v26, 0.0 }
  0xf9   :  { %1895 = vmatmul.msk.f32.gmra.mxu1 %vm46_vm0, %v336_v25 }
  0xfc   :  { %v2157_v40 = vpop.permute.xlu2 %170 }
  0xfd   :  { %v266_v26 = vadd.f32 %v2157_v40, %v2081_v10 }
 0x101   :  { %1896 = vmatmul.msk.f32.gmra.mxu1 %vm46_vm0, %v337_v27 }
 0x102   :  { %v163_v28 = vpop.permute.xlu0 %162 }
 0x103   :  { %v258_v29 = vadd.f32 %v163_v28, %v2081_v10  ;;  %v259_v32 = vadd.f32 %v163_v28, %v2089_v23 }
 0x104   :  { %v165_v30 = vpop.permute.xlu1 %164  ;;  %v183_v49 = vpop.permute.xlu2 %182 }
 0x105   :  { %v322_v31 = vmax.f32 %v258_v29, 0.0  ;;  %v323_v35 = vmax.f32 %v259_v32, 0.0  ;;  %v260_v36 = vadd.f32 %v165_v30, %v2081_v10  ;;  %v261_v44 = vadd.f32 %v165_v30, %v2089_v23 }
 0x106   :  { %v278_v5 = vadd.f32 %v183_v49, %v2081_v10  ;;  %v279_v15 = vadd.f32 %v183_v49, %v2089_v23  ;;  %v330_v30 = vmax.f32 %v266_v26, 0.0 }
 0x107   :  { %1881 = vmatmul.msk.f32.vlgmr.msrb.gmra.mxu0 %vm46_vm0, %v322_v31  ;;  %v324_v41 = vmax.f32 %v260_v36, 0.0  ;;  %v325_v48 = vmax.f32 %v261_v44, 0.0  ;;  %v267_v36 = vadd.f32 %v2157_v40, %v2089_v23 }
 0x108   :  { %v342_v11 = vmax.f32 %v278_v5, 0.0  ;;  %v343_v24 = vmax.f32 %v279_v15, 0.0 }
 0x10a   :  { %v169_v33 = vpop.permute.xlu0 %168 }
 0x10b   :  { %v264_v3 = vadd.f32 %v169_v33, %v2081_v10  ;;  %v265_v13 = vadd.f32 %v169_v33, %v2089_v23 }
 0x10c   :  { %v167_v34 = vpop.permute.xlu1 %166  ;;  %v2176_v59 = vpop.permute.xlu2 %188 }
 0x10d   :  { %v262_v51 = vadd.f32 %v167_v34, %v2081_v10  ;;  %v263_v57 = vadd.f32 %v167_v34, %v2089_v23  ;;  %v328_v9 = vmax.f32 %v264_v3, 0.0  ;;  %v329_v20 = vmax.f32 %v265_v13, 0.0 }
 0x10f   :  { %1882 = vmatmul.msk.f32.gmra.mxu0 %vm46_vm0, %v323_v35  ;;  %v326_v55 = vmax.f32 %v262_v51, 0.0  ;;  %v327_v63 = vmax.f32 %v263_v57, 0.0 }
 0x112   :  { %v2155_v38 = vpop.permute.xlu0 %172 }
 0x113   :  { %v269_v57 = vadd.f32 %v2155_v38, %v2089_v23 }
 0x114   :  { %v179_v39 = vpop.permute.xlu1 %178  ;;  %v195_v6 = vpop.permute.xlu2 %194 }
 0x115   :  { %v274_v42 = vadd.f32 %v179_v39, %v2081_v10  ;;  %v275_v46 = vadd.f32 %v179_v39, %v2089_v23  ;;  %v290_v16 = vadd.f32 %v195_v6, %v2101_v37  ;;  %v291_v27 = vadd.f32 %v195_v6, %v2120_v58 }
 0x117   :  { %v338_v43 = vmax.f32 %v274_v42, 0.0  ;;  %1883 = vmatmul.msk.f32.gmra.mxu0 %vm46_vm0, %v324_v41  ;;  %v339_v50 = vmax.f32 %v275_v46, 0.0  ;;  %v354_v25 = vmax.f32 %v290_v16, 0.0  ;;  %v355_v32 = vmax.f32 %v291_v27, 0.0 }
 0x119   :  { %1897 = vmatmul.msk.f32.gmra.mxu1 %vm46_vm0, %v338_v43  ;;  %v331_v43 = vmax.f32 %v267_v36, 0.0 }
 0x11a   :  { %v2163_v45 = vpop.permute.xlu0 %184 }
 0x11b   :  { %v280_v28 = vadd.f32 %v2163_v45, %v2081_v10  ;;  %v281_v39 = vadd.f32 %v2163_v45, %v2089_v23 }
 0x11c   :  { %v181_v47 = vpop.permute.xlu1 %180  ;;  %v2205_v21 = vpop.permute.xlu2 %200 }
 0x11d   :  { %v276_v53 = vadd.f32 %v181_v47, %v2081_v10  ;;  %v277_v61 = vadd.f32 %v181_v47, %v2089_v23  ;;  %v344_v33 = vmax.f32 %v280_v28, 0.0  ;;  %v345_v44 = vmax.f32 %v281_v39, 0.0 }
 0x11e   :  { %v268_v47 = vadd.f32 %v2155_v38, %v2081_v10 }
 0x11f   :  { %1884 = vmatmul.msk.f32.gmra.mxu0 %vm46_vm0, %v325_v48  ;;  %v340_v56 = vmax.f32 %v276_v53, 0.0  ;;  %v341_v1 = vmax.f32 %v277_v61, 0.0 }
 0x120   :  { %v332_v51 = vmax.f32 %v268_v47, 0.0 }
 0x121   :  { %1898 = vmatmul.msk.f32.gmra.mxu1 %vm46_vm0, %v339_v50 }
 0x122   :  { %v2169_v52 = vpop.permute.xlu0 %190 }
 0x124   :  { %v2172_v54 = vpop.permute.xlu1 %186  ;;  %v2217_v34 = vpop.permute.xlu2 %206 }
 0x125   :  { %v282_v45 = vadd.f32 %v2172_v54, %v2081_v10 }
 0x127   :  { %1885 = vmatmul.msk.f32.gmra.mxu0 %vm46_vm0, %v326_v55  ;;  %v346_v53 = vmax.f32 %v282_v45, 0.0 }
 0x129   :  { %1899 = vmatmul.msk.f32.gmra.mxu1 %vm46_vm0, %v340_v56 }
 0x12a   :  { %v2179_v60 = vpop.permute.xlu0 %196 }
 0x12b   :  { %v292_v41 = vadd.f32 %v2179_v60, %v2101_v37  ;;  %v293_v49 = vadd.f32 %v2179_v60, %v2120_v58  ;;  %v283_v60 = vadd.f32 %v2172_v54, %v2089_v23  ;;  %v284_v54 = vadd.f32 %v2176_v59, %v2081_v10 }
 0x12c   :  { %v193_v62 = vpop.permute.xlu1 %192  ;;  %v213_v48 = vpop.permute.xlu2 %212 }
 0x12d   :  { %v288_v0 = vadd.f32 %v193_v62, %v2081_v10  ;;  %v289_v7 = vadd.f32 %v193_v62, %v2089_v23  ;;  %v356_v46 = vmax.f32 %v292_v41, 0.0  ;;  %v308_v50 = vadd.f32 %v213_v48, %v2101_v37 }
 0x12e   :  { %v357_v55 = vmax.f32 %v293_v49, 0.0  ;;  %v309_v62 = vadd.f32 %v213_v48, %v2120_v58 }
 0x12f   :  { %v352_v2 = vmax.f32 %v288_v0, 0.0  ;;  %1886 = vmatmul.msk.f32.gmra.mxu0 %vm46_vm0, %v327_v63  ;;  %v353_v12 = vmax.f32 %v289_v7, 0.0  ;;  %v372_v56 = vmax.f32 %v308_v50, 0.0  ;;  %v333_v63 = vmax.f32 %v269_v57, 0.0 }
 0x130   :  { %v347_v0 = vmax.f32 %v283_v60, 0.0  ;;  %v373_v38 = vmax.f32 %v309_v62, 0.0 }
 0x131   :  { %1900 = vmatmul.msk.f32.gmra.mxu1 %vm46_vm0, %v341_v1  ;;  %1911 = vmatmul.msk.f32.vlgmr.msra.gmra.mxu2 %vm46_vm0, %v352_v2  ;;  %v270_v2 = vadd.f32 %v2141_v19, %v2081_v10 }
 0x132   :  { %v2187_v4 = vpop.permute.xlu0 %202 }
 0x133   :  { %v334_v7 = vmax.f32 %v270_v2, 0.0 }
 0x134   :  { %v2191_v8 = vpop.permute.xlu1 %198 }
 0x135   :  { %v294_v61 = vadd.f32 %v2191_v8, %v2101_v37  ;;  %v295_v5 = vadd.f32 %v2191_v8, %v2120_v58  ;;  %v296_v8 = vadd.f32 %v2205_v21, %v2101_v37 }
 0x137   :  { %1887 = vmatmul.msk.f32.gmra.mxu0 %vm46_vm0, %v328_v9  ;;  %v358_v1 = vmax.f32 %v294_v61, 0.0  ;;  %v348_v9 = vmax.f32 %v284_v54, 0.0  ;;  %v360_v16 = vmax.f32 %v296_v8, 0.0 }
 0x139   :  { %1901 = vmatmul.msk.f32.gmra.mxu1 %vm46_vm0, %v342_v11  ;;  %1912 = vmatmul.msk.f32.gmra.mxu2 %vm46_vm0, %v353_v12  ;;  %v359_v11 = vmax.f32 %v295_v5, 0.0  ;;  %v285_v12 = vadd.f32 %v2176_v59, %v2089_v23  ;;  %v286_v59 = vadd.f32 %v2169_v52, %v2081_v10  ;;  %v298_v10 = vadd.f32 %v2187_v4, %v2101_v37 }
 0x13a   :  { %v2197_v14 = vpop.permute.xlu0 %208 }
 0x13b   :  { %v305_v17 = vadd.f32 %v2197_v14, %v2120_v58  ;;  %v349_v15 = vmax.f32 %v285_v12, 0.0  ;;  %v350_v27 = vmax.f32 %v286_v59, 0.0 }
 0x13c   :  { %v2203_v18 = vpop.permute.xlu1 %204 }
 0x13d   :  { %v369_v22 = vmax.f32 %v305_v17, 0.0  ;;  %v301_v60 = vadd.f32 %v2203_v18, %v2120_v58 }
 0x13f   :  { %1888 = vmatmul.msk.f32.gmra.mxu0 %vm46_vm0, %v329_v20  ;;  %1928 = vmatmul.msk.f32.vlgmr.msra.gmra.mxu3 %vm46_vm0, %v369_v22  ;;  %v297_v22 = vadd.f32 %v2205_v21, %v2120_v58  ;;  %v287_v21 = vadd.f32 %v2169_v52, %v2089_v23  ;;  %v2297_v52 = vstv %s2697_s4  ;;  %s2026_s4 = smov [#allocation6]  }
 0x140   :  { %s1865_s18 = sshll.u32 %s2026_s4, 4  ;;  %s1866_s18 = int_to_ptr.vmem [resolvable:$true] %s1865_s18 }
 0x141   :  { %1902 = vmatmul.msk.f32.gmra.mxu1 %vm46_vm0, %v343_v24  ;;  %1913 = vmatmul.msk.f32.gmra.mxu2 %vm46_vm0, %v354_v25  ;;  %v2025_v25 = vmov 0   ;;  %v361_v26 = vmax.f32 %v297_v22, 0.0  ;;  %v303_v22 = vadd.f32 %v2217_v34, %v2120_v58 }
 0x142   :  { %v215_v3 = vpop.permute.xlu0 %214  ;;  %1964 = vset.pattern.permute.xlu0 %v2025_v25  ;;  %1965 = vset.pattern.permute.xlu1 %v2025_v25 }
 0x143   :  { %v310_v6 = vadd.f32 %v215_v3, %v2101_v37  ;;  %v311_v13 = vadd.f32 %v215_v3, %v2120_v58  ;;  %1966 = vset.pattern.permute.xlu2 %v2025_v25 }
 0x144   :  { %v211_v29 = vpop.permute.xlu1 %210 }
 0x145   :  { %v306_v31 = vadd.f32 %v211_v29, %v2101_v37  ;;  %v307_v42 = vadd.f32 %v211_v29, %v2120_v58  ;;  %v374_v19 = vmax.f32 %v310_v6, 0.0  ;;  %v375_v17 = vmax.f32 %v311_v13, 0.0 }
 0x147   :  { %v370_v35 = vmax.f32 %v306_v31, 0.0  ;;  %1889 = vmatmul.msk.f32.gmra.mxu0 %vm46_vm0, %v330_v30  ;;  %v371_v40 = vmax.f32 %v307_v42, 0.0  ;;  %v351_v30 = vmax.f32 %v287_v21, 0.0  ;;  %v362_v31 = vmax.f32 %v298_v10, 0.0 }
 0x149   :  { %1903 = vmatmul.msk.f32.gmra.mxu1 %vm46_vm0, %v344_v33  ;;  %1914 = vmatmul.msk.f32.gmra.mxu2 %vm46_vm0, %v355_v32  ;;  %v219_v33 = vpop.permute.xlu2 %218 }
 0x14a   :  { %1929 = vmatmul.msk.f32.gmra.mxu3 %vm46_vm0, %v370_v35  ;;  %v299_v35 = vadd.f32 %v2187_v4, %v2120_v58  ;;  %v314_v23 = vadd.f32 %v219_v33, %v2101_v37  ;;  %v300_v4 = vadd.f32 %v2203_v18, %v2101_v37  ;;  %v315_v47 = vadd.f32 %v219_v33, %v2120_v58 }
 0x14b   :  { %v302_v18 = vadd.f32 %v2217_v34, %v2101_v37  ;;  %v304_v34 = vadd.f32 %v2197_v14, %v2101_v37 }
 0x14c   :  { %v217_v20 = vpop.permute.xlu1 %216  ;;  %v363_v41 = vmax.f32 %v299_v35, 0.0  ;;  %v364_v49 = vmax.f32 %v300_v4, 0.0 }
 0x14d   :  { %v312_v24 = vadd.f32 %v217_v20, %v2101_v37  ;;  %v313_v29 = vadd.f32 %v217_v20, %v2120_v58  ;;  %v366_v12 = vmax.f32 %v302_v18, 0.0 }
 0x14f   :  { %1890 = vmatmul.msk.f32.gmra.mxu0 %vm46_vm0, %v331_v43  ;;  %v376_v28 = vmax.f32 %v312_v24, 0.0  ;;  %v377_v32 = vmax.f32 %v313_v29, 0.0  ;;  %v378_v43 = vmax.f32 %v314_v23, 0.0 }
 0x151   :  { %1904 = vmatmul.msk.f32.gmra.mxu1 %vm46_vm0, %v345_v44  ;;  %1915 = vmatmul.msk.f32.gmra.mxu2 %vm46_vm0, %v356_v46 }
 0x152   :  { %1930 = vmatmul.msk.f32.gmra.mxu3 %vm46_vm0, %v371_v40 }
 0x157   :  { %1891 = vmatmul.msk.f32.gmra.mxu0 %vm46_vm0, %v332_v51  ;;  %v379_v51 = vmax.f32 %v315_v47, 0.0 }
 0x159   :  { %1905 = vmatmul.msk.f32.gmra.mxu1 %vm46_vm0, %v346_v53  ;;  %1916 = vmatmul.msk.f32.gmra.mxu2 %vm46_vm0, %v357_v55  ;;  %v221_v53 = vpop.permute.xlu0 %220 }
 0x15a   :  { %1931 = vmatmul.msk.f32.gmra.mxu3 %vm46_vm0, %v372_v56  ;;  %v316_v61 = vadd.f32 %v221_v53, %v2101_v37 }
 0x15c   :  { %v380_v2 = vmax.f32 %v316_v61, 0.0 }
 0x15f   :  { %1892 = vmatmul.msk.f32.gmra.mxu0 %vm46_vm0, %v333_v63 }
 0x161   :  { %1906 = vmatmul.msk.f32.gmra.mxu1 %vm46_vm0, %v347_v0  ;;  %1917 = vmatmul.msk.f32.gmra.mxu2 %vm46_vm0, %v358_v1  ;;  %v365_v1 = vmax.f32 %v301_v60, 0.0 }
 0x162   :  { %1932 = vmatmul.msk.f32.gmra.mxu3 %vm46_vm0, %v373_v38 }
 0x167   :  { %1893 = vmatmul.msk.f32.gmra.mxu0 %vm46_vm0, %v334_v7  ;;  %v317_v7 = vadd.f32 %v221_v53, %v2120_v58 }
 0x169   :  { %1907 = vmatmul.msk.f32.gmra.mxu1 %vm46_vm0, %v348_v9  ;;  %1918 = vmatmul.msk.f32.gmra.mxu2 %vm46_vm0, %v359_v11  ;;  %v381_v13 = vmax.f32 %v317_v7, 0.0 }
 0x16a   :  { %1933 = vmatmul.msk.f32.gmra.mxu3 %vm46_vm0, %v374_v19 }
 0x16e   :  { %v2316_v6 = vpop.f32.mrf.mxu1 }
 0x171   :  { %1908 = vmatmul.msk.f32.gmra.mxu1 %vm46_vm0, %v349_v15  ;;  %1919 = vmatmul.msk.f32.gmra.mxu2 %vm46_vm0, %v360_v16  ;;  %v223_v15 = vpop.permute.xlu1 %222 }
 0x172   :  { %1934 = vmatmul.msk.f32.gmra.mxu3 %vm46_vm0, %v375_v17  ;;  %v318_v59 = vadd.f32 %v223_v15, %v2101_v37 }
 0x174   :  { %v382_v10 = vmax.f32 %v318_v59, 0.0 }
 0x179   :  { %1909 = vmatmul.msk.f32.gmra.mxu1 %vm46_vm0, %v350_v27  ;;  %1920 = vmatmul.msk.f32.gmra.mxu2 %vm46_vm0, %v361_v26  ;;  %v2325_v26 = vpop.f32.mrf.mxu1 }
 0x17a   :  { %1935 = vmatmul.msk.f32.gmra.mxu3 %vm46_vm0, %v376_v28  ;;  %v367_v28 = vmax.f32 %v303_v22, 0.0 }
 0x181   :  { %1910 = vmatmul.msk.f32.gmra.mxu1 %vm46_vm0, %v351_v30  ;;  %1921 = vmatmul.msk.f32.gmra.mxu2 %vm46_vm0, %v362_v31 }
 0x182   :  { %1936 = vmatmul.msk.f32.gmra.mxu3 %vm46_vm0, %v377_v32  ;;  %v319_v32 = vadd.f32 %v223_v15, %v2120_v58 }
 0x184   :  { %v599_v36 = vpop.f32.mrf.mxu0 }
 0x185   :  { %v793_v39 = vadd.f32 %v2297_v52, %v599_v36  ;;  %v368_v36 = vmax.f32 %v304_v34, 0.0 }
 0x187   :  { %v857_v42 = vmax.f32 %v793_v39, 0.0  ;;  %v2334_v39 = vpop.f32.mrf.mxu1 }
 0x189   :  { %v985_v44 = vrot.slane %v857_v42, 2  ;;  %v986_v46 = vrot.slane %v857_v42, 4  ;;  %v987_v40 = vrot.slane %v857_v42, 6  ;;  %1177 = vst [vmem:[#allocation1] ss:$4 sm:$0xff] %v857_v42  ;;  %1922 = vmatmul.msk.f32.gmra.mxu2 %vm46_vm0, %v363_v41  ;;  %v383_v42 = vmax.f32 %v319_v32, 0.0 }
 0x18a   :  { %1937 = vmatmul.msk.f32.gmra.mxu3 %vm46_vm0, %v378_v43  ;;  %v225_v43 = vpop.permute.xlu2 %224 }
 0x18b   :  { %1179 = vst [vmem:[#allocation1 + $0x1] ss:$4 sm:$0xff] %v985_v44  ;;  %v320_v14 = vadd.f32 %v225_v43, %v2101_v37  ;;  %v321_v37 = vadd.f32 %v225_v43, %v2120_v58 }
 0x18c   :  { %1181 = vst [vmem:[#allocation1 + $0x2] ss:$4 sm:$0xff] %v986_v46  ;;  %v602_v48 = vpop.f32.mrf.mxu0 }
 0x18d   :  { %1183 = vst [vmem:[#allocation1 + $0x3] ss:$4 sm:$0xff] %v987_v40  ;;  %v794_v45 = vadd.f32 %v2297_v52, %v602_v48 }
 0x18f   :  { %v858_v50 = vmax.f32 %v794_v45, 0.0 }
 0x191   :  { %v988_v55 = vrot.slane %v858_v50, 2  ;;  %v989_v56 = vrot.slane %v858_v50, 4  ;;  %v990_v57 = vrot.slane %v858_v50, 6  ;;  %1185 = vst [vmem:[#allocation1 + $0x20] ss:$4 sm:$0xff] %v858_v50  ;;  %1923 = vmatmul.msk.f32.gmra.mxu2 %vm46_vm0, %v364_v49  ;;  %v384_v50 = vmax.f32 %v320_v14, 0.0 }
 0x192   :  { %1938 = vmatmul.msk.f32.gmra.mxu3 %vm46_vm0, %v379_v51 }
 0x193   :  { %1187 = vst [vmem:[#allocation1 + $0x21] ss:$4 sm:$0xff] %v988_v55 }
 0x194   :  { %v1192_v62 = vld.sshfl [vmem:[#allocation1] sm:$0xff pattern:$0x73625140]  ;;  %1189 = vst [vmem:[#allocation1 + $0x22] ss:$4 sm:$0xff] %v989_v56  ;;  %v605_v63 = vpop.f32.mrf.mxu0 }
 0x195   :  { %1191 = vst [vmem:[#allocation1 + $0x23] ss:$4 sm:$0xff] %v990_v57  ;;  %1505 = vperm.xlu0 %1964, %v1192_v62   ;;  %v795_v0 = vadd.f32 %v2297_v52, %v605_v63  ;;  %v385_v62 = vmax.f32 %v321_v37, 0.0 }
 0x196   :  { %v2340_v45 = vpop.f32.mrf.mxu1 }
 0x197   :  { %v859_v38 = vmax.f32 %v795_v0, 0.0 }
 0x199   :  { %v991_v3 = vrot.slane %v859_v38, 2  ;;  %v992_v54 = vrot.slane %v859_v38, 4  ;;  %v993_v5 = vrot.slane %v859_v38, 6  ;;  %1194 = vst [vmem:[#allocation1] ss:$4 sm:$0xff] %v859_v38  ;;  %1924 = vmatmul.msk.f32.gmra.mxu2 %vm46_vm0, %v365_v1 }
 0x19a   :  { %1939 = vmatmul.msk.f32.gmra.mxu3 %vm46_vm0, %v380_v2 }
 0x19b   :  { %1195 = vst [vmem:[#allocation1 + $0x1] ss:$4 sm:$0xff] %v991_v3 }
 0x19c   :  { %v1193_v9 = vld.sshfl [vmem:[#allocation1 + $0x20] sm:$0xff pattern:$0x73625140]  ;;  %1196 = vst [vmem:[#allocation1 + $0x2] ss:$4 sm:$0xff] %v992_v54  ;;  %v608_v11 = vpop.f32.mrf.mxu0 }
 0x19d   :  { %1197 = vst [vmem:[#allocation1 + $0x3] ss:$4 sm:$0xff] %v993_v5  ;;  %1508 = vperm.xlu1 %1965, %v1193_v9   ;;  %v796_v19 = vadd.f32 %v2297_v52, %v608_v11 }
 0x19e   :  { %v2345_v63 = vpop.f32.mrf.mxu1 }
 0x19f   :  { %v860_v8 = vmax.f32 %v796_v19, 0.0 }
 0x1a1   :  { %v994_v16 = vrot.slane %v860_v8, 2  ;;  %v995_v17 = vrot.slane %v860_v8, 4  ;;  %v996_v20 = vrot.slane %v860_v8, 6  ;;  %1198 = vst [vmem:[#allocation1 + $0x20] ss:$4 sm:$0xff] %v860_v8  ;;  %1925 = vmatmul.msk.f32.gmra.mxu2 %vm46_vm0, %v366_v12 }
 0x1a2   :  { %1940 = vmatmul.msk.f32.gmra.mxu3 %vm46_vm0, %v381_v13 }
 0x1a3   :  { %1199 = vst [vmem:[#allocation1 + $0x21] ss:$4 sm:$0xff] %v994_v16 }
 0x1a4   :  { %v1202_v24 = vld.sshfl [vmem:[#allocation1] sm:$0xff pattern:$0x73625140]  ;;  %1200 = vst [vmem:[#allocation1 + $0x22] ss:$4 sm:$0xff] %v995_v17  ;;  %v611_v25 = vpop.f32.mrf.mxu0 }
 0x1a5   :  { %1201 = vst [vmem:[#allocation1 + $0x23] ss:$4 sm:$0xff] %v996_v20  ;;  %1511 = vperm.xlu2 %1966, %v1202_v24   ;;  %v797_v27 = vadd.f32 %v2297_v52, %v611_v25 }
 0x1a6   :  { %v2349_v9 = vpop.f32.mrf.mxu1 }
 0x1a7   :  { %v861_v21 = vmax.f32 %v797_v27, 0.0 }
 0x1a9   :  { %v997_v29 = vrot.slane %v861_v21, 2  ;;  %v998_v30 = vrot.slane %v861_v21, 4  ;;  %v999_v31 = vrot.slane %v861_v21, 6  ;;  %1204 = vst [vmem:[#allocation1] ss:$4 sm:$0xff] %v861_v21  ;;  %1926 = vmatmul.msk.f32.gmra.mxu2 %vm46_vm0, %v367_v28 }
 0x1aa   :  { %1941 = vmatmul.msk.f32.gmra.mxu3 %vm46_vm0, %v382_v10 }
 0x1ab   :  { %1205 = vst [vmem:[#allocation1 + $0x1] ss:$4 sm:$0xff] %v997_v29 }
 0x1ac   :  { %v1203_v33 = vld.sshfl [vmem:[#allocation1 + $0x20] sm:$0xff pattern:$0x73625140]  ;;  %1206 = vst [vmem:[#allocation1 + $0x2] ss:$4 sm:$0xff] %v998_v30  ;;  %v614_v35 = vpop.f32.mrf.mxu0 }
 0x1ad   :  { %1207 = vst [vmem:[#allocation1 + $0x3] ss:$4 sm:$0xff] %v999_v31  ;;  %1514 = vperm.xlu1 %1965, %v1203_v33   ;;  %v798_v23 = vadd.f32 %v2297_v52, %v614_v35  ;;  %v806_v35 = vadd.f32 %v2297_v52, %v2316_v6 }
 0x1ae   :  { %v2352_v22 = vpop.f32.mrf.mxu1 }
 0x1af   :  { %v862_v41 = vmax.f32 %v798_v23, 0.0  ;;  %v870_v43 = vmax.f32 %v806_v35, 0.0 }
 0x1b1   :  { %v1000_v44 = vrot.slane %v862_v41, 2  ;;  %v1001_v46 = vrot.slane %v862_v41, 4  ;;  %v1002_v40 = vrot.slane %v862_v41, 6  ;;  %1208 = vst [vmem:[#allocation1 + $0x20] ss:$4 sm:$0xff] %v862_v41  ;;  %1927 = vmatmul.msk.f32.gmra.mxu2 %vm46_vm0, %v368_v36  ;;  %v1024_v14 = vrot.slane %v870_v43, 2 }
 0x1b2   :  { %1942 = vmatmul.msk.f32.gmra.mxu3 %vm46_vm0, %v383_v42 }
 0x1b3   :  { %1209 = vst [vmem:[#allocation1 + $0x21] ss:$4 sm:$0xff] %v1000_v44 }
 0x1b4   :  { %v1212_v4 = vld.sshfl [vmem:[#allocation1] sm:$0xff pattern:$0x73625140]  ;;  %1210 = vst [vmem:[#allocation1 + $0x22] ss:$4 sm:$0xff] %v1001_v46  ;;  %v617_v47 = vpop.f32.mrf.mxu0 }
 0x1b5   :  { %1211 = vst [vmem:[#allocation1 + $0x23] ss:$4 sm:$0xff] %v1002_v40  ;;  %1517 = vperm.xlu2 %1966, %v1212_v4   ;;  %v799_v48 = vadd.f32 %v2297_v52, %v617_v47  ;;  %v1025_v47 = vrot.slane %v870_v43, 4 }
 0x1b6   :  { %v2356_v30 = vpop.f32.mrf.mxu1 }
 0x1b7   :  { %v863_v49 = vmax.f32 %v799_v48, 0.0  ;;  %v1026_v48 = vrot.slane %v870_v43, 6 }
 0x1b9   :  { %v1003_v51 = vrot.slane %v863_v49, 2  ;;  %v1004_v53 = vrot.slane %v863_v49, 4  ;;  %v1005_v55 = vrot.slane %v863_v49, 6  ;;  %1214 = vst [vmem:[#allocation1] ss:$4 sm:$0xff] %v863_v49  ;;  %v808_v49 = vadd.f32 %v2297_v52, %v2334_v39 }
 0x1ba   :  { %1943 = vmatmul.msk.f32.gmra.mxu3 %vm46_vm0, %v384_v50  ;;  %v807_v50 = vadd.f32 %v2297_v52, %v2325_v26  ;;  %v810_v39 = vadd.f32 %v2297_v52, %v2345_v63 }
 0x1bb   :  { %1215 = vst [vmem:[#allocation1 + $0x1] ss:$4 sm:$0xff] %v1003_v51  ;;  %v872_v51 = vmax.f32 %v808_v49, 0.0 }
 0x1bc   :  { %v1213_v56 = vld.sshfl [vmem:[#allocation1 + $0x20] sm:$0xff pattern:$0x73625140]  ;;  %1216 = vst [vmem:[#allocation1 + $0x2] ss:$4 sm:$0xff] %v1004_v53  ;;  %v620_v57 = vpop.f32.mrf.mxu0 }
 0x1bd   :  { %1217 = vst [vmem:[#allocation1 + $0x3] ss:$4 sm:$0xff] %v1005_v55  ;;  %1520 = vperm.xlu0 %1964, %v1213_v56   ;;  %v800_v60 = vadd.f32 %v2297_v52, %v620_v57  ;;  %v871_v55 = vmax.f32 %v807_v50, 0.0  ;;  %v1030_v37 = vrot.slane %v872_v51, 2  ;;  %v1031_v57 = vrot.slane %v872_v51, 4 }
 0x1be   :  { %v2361_v44 = vpop.f32.mrf.mxu1 }
 0x1bf   :  { %v864_v61 = vmax.f32 %v800_v60, 0.0  ;;  %v1028_v26 = vrot.slane %v871_v55, 4 }
 0x1c1   :  { %v1006_v0 = vrot.slane %v864_v61, 2  ;;  %v1007_v1 = vrot.slane %v864_v61, 4  ;;  %v1008_v38 = vrot.slane %v864_v61, 6  ;;  %1218 = vst [vmem:[#allocation1 + $0x20] ss:$4 sm:$0xff] %v864_v61  ;;  %v1032_v61 = vrot.slane %v872_v51, 6 }
 0x1c2   :  { %1944 = vmatmul.msk.f32.gmra.mxu3 %vm46_vm0, %v385_v62  ;;  %v1027_v62 = vrot.slane %v871_v55, 2  ;;  %vm1852_vm0 = vcmask 1041409  }
 0x1c3   :  { %1219 = vst [vmem:[#allocation1 + $0x21] ss:$4 sm:$0xff] %v1006_v0  ;;  %v2371_v0 = vpop.f32.mrf.mxu2 }
 0x1c4   :  { %v1222_v2 = vld.sshfl [vmem:[#allocation1] sm:$0xff pattern:$0x73625140]  ;;  %1220 = vst [vmem:[#allocation1 + $0x22] ss:$4 sm:$0xff] %v1007_v1  ;;  %v623_v58 = vpop.f32.mrf.mxu0  ;;  %v1029_v1 = vrot.slane %v871_v55, 6 }
 0x1c5   :  { %1221 = vst [vmem:[#allocation1 + $0x23] ss:$4 sm:$0xff] %v1008_v38  ;;  %1523 = vperm.xlu1 %1965, %v1222_v2   ;;  %v801_v3 = vadd.f32 %v2297_v52, %v623_v58  ;;  %v809_v2 = vadd.f32 %v2297_v52, %v2340_v45  ;;  %v874_v58 = vmax.f32 %v810_v39, 0.0 }
 0x1c6   :  { %v2367_v53 = vpop.f32.mrf.mxu1 }
 0x1c7   :  { %v865_v54 = vmax.f32 %v801_v3, 0.0  ;;  %v873_v3 = vmax.f32 %v809_v2, 0.0 }
 0x1c9   :  { %v1009_v5 = vrot.slane %v865_v54, 2  ;;  %v1010_v18 = vrot.slane %v865_v54, 4  ;;  %v1011_v7 = vrot.slane %v865_v54, 6  ;;  %1224 = vst [vmem:[#allocation1] ss:$4 sm:$0xff] %v865_v54  ;;  %v1036_v54 = vrot.slane %v874_v58, 2 }
 0x1cb   :  { %1225 = vst [vmem:[#allocation1 + $0x1] ss:$4 sm:$0xff] %v1009_v5  ;;  %v1037_v5 = vrot.slane %v874_v58, 4 }
 0x1cc   :  { %v1223_v11 = vld.sshfl [vmem:[#allocation1 + $0x20] sm:$0xff pattern:$0x73625140]  ;;  %1226 = vst [vmem:[#allocation1 + $0x2] ss:$4 sm:$0xff] %v1010_v18  ;;  %v626_v19 = vpop.f32.mrf.mxu0  ;;  %v1038_v18 = vrot.slane %v874_v58, 6 }
 0x1cd   :  { %1227 = vst [vmem:[#allocation1 + $0x3] ss:$4 sm:$0xff] %v1011_v7  ;;  %1526 = vperm.xlu2 %1966, %v1223_v11   ;;  %v802_v12 = vadd.f32 %v2297_v52, %v626_v19  ;;  %v812_v7 = vadd.f32 %v2297_v52, %v2352_v22  ;;  %v2379_v11 = vpop.f32.mrf.mxu2  ;;  %v1033_v19 = vrot.slane %v873_v3, 2 }
 0x1ce   :  { %v2373_v38 = vpop.f32.mrf.mxu1 }
 0x1cf   :  { %v866_v8 = vmax.f32 %v802_v12, 0.0  ;;  %v1034_v12 = vrot.slane %v873_v3, 4 }
 0x1d1   :  { %v1012_v13 = vrot.slane %v866_v8, 2  ;;  %v1013_v15 = vrot.slane %v866_v8, 4  ;;  %v1014_v16 = vrot.slane %v866_v8, 6  ;;  %1228 = vst [vmem:[#allocation1 + $0x20] ss:$4 sm:$0xff] %v866_v8 }
 0x1d3   :  { %1229 = vst [vmem:[#allocation1 + $0x21] ss:$4 sm:$0xff] %v1012_v13  ;;  %v1035_v13 = vrot.slane %v873_v3, 6 }
 0x1d4   :  { %v1232_v17 = vld.sshfl [vmem:[#allocation1] sm:$0xff pattern:$0x73625140]  ;;  %1230 = vst [vmem:[#allocation1 + $0x22] ss:$4 sm:$0xff] %v1013_v15  ;;  %v629_v20 = vpop.f32.mrf.mxu0  ;;  %v811_v15 = vadd.f32 %v2297_v52, %v2349_v9 }
 0x1d5   :  { %1231 = vst [vmem:[#allocation1 + $0x23] ss:$4 sm:$0xff] %v1014_v16  ;;  %1529 = vperm.xlu0 %1964, %v1232_v17   ;;  %v803_v59 = vadd.f32 %v2297_v52, %v629_v20  ;;  %v876_v16 = vmax.f32 %v812_v7, 0.0 }
 0x1d6   :  { %v2381_v8 = vpop.f32.mrf.mxu1  ;;  %v875_v17 = vmax.f32 %v811_v15, 0.0 }
 0x1d7   :  { %v867_v24 = vmax.f32 %v803_v59, 0.0  ;;  %v1042_v20 = vrot.slane %v876_v16, 2  ;;  %v1043_v59 = vrot.slane %v876_v16, 4 }
 0x1d9   :  { %v1015_v25 = vrot.slane %v867_v24, 2  ;;  %v1016_v27 = vrot.slane %v867_v24, 4  ;;  %v1017_v28 = vrot.slane %v867_v24, 6  ;;  %1234 = vst [vmem:[#allocation1] ss:$4 sm:$0xff] %v867_v24  ;;  %v1044_v24 = vrot.slane %v876_v16, 6 }
 0x1db   :  { %1235 = vst [vmem:[#allocation1 + $0x1] ss:$4 sm:$0xff] %v1015_v25  ;;  %v2385_v25 = vpop.f32.mrf.mxu2 }
 0x1dc   :  { %v1233_v21 = vld.sshfl [vmem:[#allocation1 + $0x20] sm:$0xff pattern:$0x73625140]  ;;  %1236 = vst [vmem:[#allocation1 + $0x2] ss:$4 sm:$0xff] %v1016_v27  ;;  %v632_v10 = vpop.f32.mrf.mxu0  ;;  %v814_v27 = vadd.f32 %v2297_v52, %v2361_v44 }
 0x1dd   :  { %1237 = vst [vmem:[#allocation1 + $0x3] ss:$4 sm:$0xff] %v1017_v28  ;;  %1532 = vperm.xlu1 %1965, %v1233_v21   ;;  %v804_v29 = vadd.f32 %v2297_v52, %v632_v10  ;;  %v1039_v28 = vrot.slane %v875_v17, 2  ;;  %v1040_v10 = vrot.slane %v875_v17, 4 }
 0x1de   :  { %v674_v9 = vpop.f32.mrf.mxu1 }
 0x1df   :  { %v868_v31 = vmax.f32 %v804_v29, 0.0  ;;  %v1041_v29 = vrot.slane %v875_v17, 6  ;;  %v818_v2 = vadd.f32 %v2297_v52, %v674_v9 }
 0x1e1   :  { %v1018_v34 = vrot.slane %v868_v31, 2  ;;  %v1019_v32 = vrot.slane %v868_v31, 4  ;;  %v1020_v33 = vrot.slane %v868_v31, 6  ;;  %1238 = vst [vmem:[#allocation1 + $0x20] ss:$4 sm:$0xff] %v868_v31  ;;  %v813_v31 = vadd.f32 %v2297_v52, %v2356_v30 }
 0x1e2   :  { %v882_v7 = vmax.f32 %v818_v2, 0.0 }
 0x1e3   :  { %1239 = vst [vmem:[#allocation1 + $0x21] ss:$4 sm:$0xff] %v1018_v34  ;;  %v878_v34 = vmax.f32 %v814_v27, 0.0 }
 0x1e4   :  { %v1242_v23 = vld.sshfl [vmem:[#allocation1] sm:$0xff pattern:$0x73625140]  ;;  %1240 = vst [vmem:[#allocation1 + $0x22] ss:$4 sm:$0xff] %v1019_v32  ;;  %v635_v36 = vpop.f32.mrf.mxu0  ;;  %v877_v32 = vmax.f32 %v813_v31, 0.0 }
 0x1e5   :  { %1241 = vst [vmem:[#allocation1 + $0x23] ss:$4 sm:$0xff] %v1020_v33  ;;  %1535 = vperm.xlu2 %1966, %v1242_v23   ;;  %v805_v41 = vadd.f32 %v2297_v52, %v635_v36  ;;  %v1048_v33 = vrot.slane %v878_v34, 2  ;;  %v1049_v23 = vrot.slane %v878_v34, 4  ;;  %v2391_v36 = vpop.f32.mrf.mxu2  ;;  %v1061_v15 = vrot.slane %v882_v7, 4 }
 0x1e6   :  { %v2395_v44 = vpop.f32.mrf.mxu1  ;;  %v1045_v30 = vrot.slane %v877_v32, 2 }
 0x1e7   :  { %v869_v42 = vmax.f32 %v805_v41, 0.0  ;;  %v1696_v41 = vlaneseq }
 0x1e9   :  { %v1021_v46 = vrot.slane %v869_v42, 2  ;;  %v1022_v40 = vrot.slane %v869_v42, 4  ;;  %1244 = vst [vmem:[#allocation1] ss:$4 sm:$0xff] %v869_v42  ;;  %v1023_v6 = vrot.slane %v869_v42, 6  ;;  %v1050_v42 = vrot.slane %v878_v34, 6 }
 0x1eb   :  { %1245 = vst [vmem:[#allocation1 + $0x1] ss:$4 sm:$0xff] %v1021_v46 }
 0x1ec   :  { %v1243_v4 = vld.sshfl [vmem:[#allocation1 + $0x20] sm:$0xff pattern:$0x73625140]  ;;  %1246 = vst [vmem:[#allocation1 + $0x2] ss:$4 sm:$0xff] %v1022_v40  ;;  %v1046_v40 = vrot.slane %v877_v32, 4 }
 0x1ed   :  { %1248 = vst [vmem:[#allocation1 + $0x20] ss:$4 sm:$0xff] %v870_v43  ;;  %1538 = vperm.xlu0 %1964, %v1243_v4   ;;  %v816_v43 = vadd.f32 %v2297_v52, %v2373_v38  ;;  %v1047_v4 = vrot.slane %v877_v32, 6 }
 0x1ee   :  { %1249 = vst [vmem:[#allocation1 + $0x21] ss:$4 sm:$0xff] %v1024_v14  ;;  %v2397_v14 = vand.u32 127, %v1696_v41 }
 0x1ef   :  { %1250 = vst [vmem:[#allocation1 + $0x22] ss:$4 sm:$0xff] %v1025_v47 }
 0x1f0   :  { %1251 = vst [vmem:[#allocation1 + $0x23] ss:$4 sm:$0xff] %v1026_v48  ;;  %v880_v48 = vmax.f32 %v816_v43, 0.0  ;;  %v2402_v49 = vadd.s32 4294967288, %v2397_v14  ;;  %v2424_v9 = vadd.s32 4294967264, %v2397_v14 }
 0x1f1   :  { %1247 = vst [vmem:[#allocation1 + $0x3] ss:$4 sm:$0xff] %v1023_v6  ;;  %v815_v6 = vadd.f32 %v2297_v52, %v2367_v53 }
 0x1f7   :  { %v1253_v56 = vld.sshfl [vmem:[#allocation1 + $0x20] sm:$0xff pattern:$0x73625140] }
 0x1f8   :  { %1258 = vst [vmem:[#allocation1 + $0x20] ss:$4 sm:$0xff] %v872_v51  ;;  %v1252_v60 = vld.sshfl [vmem:[#allocation1] sm:$0xff pattern:$0x73625140]  ;;  %1544 = vperm.xlu2 %1966, %v1253_v56   ;;  %v2405_v51 = vadd.s32 4294967280, %v2397_v14 }
 0x1f9   :  { %1259 = vst [vmem:[#allocation1 + $0x21] ss:$4 sm:$0xff] %v1030_v37  ;;  %1541 = vperm.xlu1 %1965, %v1252_v60   ;;  %v1054_v60 = vrot.slane %v880_v48, 2 }
 0x1fa   :  { %1260 = vst [vmem:[#allocation1 + $0x22] ss:$4 sm:$0xff] %v1031_v57  ;;  %v879_v57 = vmax.f32 %v815_v6, 0.0 }
 0x1fb   :  { %1261 = vst [vmem:[#allocation1 + $0x23] ss:$4 sm:$0xff] %v1032_v61  ;;  %v2409_v61 = vpop.f32.mrf.mxu2 }
 0x1fc   :  { %1254 = vst [vmem:[#allocation1] ss:$4 sm:$0xff] %v871_v55 }
 0x1fd   :  { %1255 = vst [vmem:[#allocation1 + $0x1] ss:$4 sm:$0xff] %v1027_v62  ;;  %v1055_v62 = vrot.slane %v880_v48, 4 }
 0x1fe   :  { %1256 = vst [vmem:[#allocation1 + $0x2] ss:$4 sm:$0xff] %v1028_v26  ;;  %v1056_v26 = vrot.slane %v880_v48, 6 }
 0x1ff   :  { %1257 = vst [vmem:[#allocation1 + $0x3] ss:$4 sm:$0xff] %v1029_v1  ;;  %v1512_v56 = vpop.permute.xlu2 %1511  ;;  %v680_v1 = vpop.f32.mrf.mxu1 }
 0x200   :  { %v1704_v38 = vperm.slane %v1512_v56, %v2405_v51 }
 0x202   :  { %v1263_v63 = vld.sshfl [vmem:[#allocation1 + $0x20] sm:$0xff pattern:$0x73625140] }
 0x203   :  { %1268 = vst [vmem:[#allocation1 + $0x20] ss:$4 sm:$0xff] %v874_v58  ;;  %1550 = vperm.xlu1 %1965, %v1263_v63   ;;  %v1051_v58 = vrot.slane %v879_v57, 2  ;;  %v1052_v63 = vrot.slane %v879_v57, 4 }
 0x204   :  { %1269 = vst [vmem:[#allocation1 + $0x21] ss:$4 sm:$0xff] %v1036_v54 }
 0x205   :  { %1270 = vst [vmem:[#allocation1 + $0x22] ss:$4 sm:$0xff] %v1037_v5  ;;  %v1053_v5 = vrot.slane %v879_v57, 6 }
 0x206   :  { %1271 = vst [vmem:[#allocation1 + $0x23] ss:$4 sm:$0xff] %v1038_v18  ;;  %v1262_v45 = vld.sshfl [vmem:[#allocation1] sm:$0xff pattern:$0x73625140]  ;;  %v817_v18 = vadd.f32 %v2297_v52, %v2381_v8 }
 0x207   :  { %1264 = vst [vmem:[#allocation1] ss:$4 sm:$0xff] %v873_v3  ;;  %1547 = vperm.xlu0 %1964, %v1262_v45   ;;  %v1506_v47 = vpop.permute.xlu0 %1505  ;;  %v2417_v45 = vpop.f32.mrf.mxu2 }
 0x208   :  { %1265 = vst [vmem:[#allocation1 + $0x1] ss:$4 sm:$0xff] %v1033_v19  ;;  %v1698_v55 = vperm.slane %v1506_v47, %v2397_v14  ;;  %v881_v19 = vmax.f32 %v817_v18, 0.0 }
 0x209   :  { %1266 = vst [vmem:[#allocation1 + $0x2] ss:$4 sm:$0xff] %v1034_v12  ;;  %v1060_v12 = vrot.slane %v882_v7, 2 }
 0x20a   :  { %1267 = vst [vmem:[#allocation1 + $0x3] ss:$4 sm:$0xff] %v1035_v13 }
 0x20d   :  { %v1273_v22 = vld.sshfl [vmem:[#allocation1 + $0x20] sm:$0xff pattern:$0x73625140] }
 0x20e   :  { %1278 = vst [vmem:[#allocation1 + $0x20] ss:$4 sm:$0xff] %v876_v16  ;;  %v683_v16 = vpop.f32.mrf.mxu1 }
 0x20f   :  { %1279 = vst [vmem:[#allocation1 + $0x21] ss:$4 sm:$0xff] %v1042_v20  ;;  %1556 = vperm.xlu0 %1964, %v1273_v22   ;;  %v1509_v50 = vpop.permute.xlu1 %1508  ;;  %v1057_v20 = vrot.slane %v881_v19, 2  ;;  %v820_v22 = vadd.f32 %v2297_v52, %v680_v1  ;;  %v1518_v31 = vpop.permute.xlu2 %1517 }
 0x210   :  { %1280 = vst [vmem:[#allocation1 + $0x22] ss:$4 sm:$0xff] %v1043_v59  ;;  %v1700_v37 = vperm.slane %v1509_v50, %v2402_v49  ;;  %v2421_v59 = vadd.s32 4294967272, %v2397_v14 }
 0x211   :  { %1281 = vst [vmem:[#allocation1 + $0x23] ss:$4 sm:$0xff] %v1044_v24  ;;  %v1272_v21 = vld.sshfl [vmem:[#allocation1] sm:$0xff pattern:$0x73625140]  ;;  %v1058_v24 = vrot.slane %v881_v19, 4 }
 0x212   :  { %1274 = vst [vmem:[#allocation1] ss:$4 sm:$0xff] %v875_v17  ;;  %1553 = vperm.xlu2 %1966, %v1272_v21   ;;  %v1702_v39 = vsel %vm1701_vm1, %v1700_v37, %v1698_v55  ;;  %v1062_v17 = vrot.slane %v882_v7, 6 }
 0x213   :  { %1275 = vst [vmem:[#allocation1 + $0x1] ss:$4 sm:$0xff] %v1039_v28  ;;  %v1706_v54 = vsel %vm1705_vm2, %v1704_v38, %v1702_v39  ;;  %v1059_v28 = vrot.slane %v881_v19, 6 }
 0x214   :  { %1276 = vst [vmem:[#allocation1 + $0x2] ss:$4 sm:$0xff] %v1040_v10  ;;  %v819_v10 = vadd.f32 %v2297_v52, %v2395_v44 }
 0x215   :  { %1277 = vst [vmem:[#allocation1 + $0x3] ss:$4 sm:$0xff] %v1041_v29  ;;  %v884_v29 = vmax.f32 %v820_v22, 0.0 }
 0x217   :  { %v1066_v41 = vrot.slane %v884_v29, 2  ;;  %v1067_v43 = vrot.slane %v884_v29, 4  ;;  %v1068_v44 = vrot.slane %v884_v29, 6 }
 0x218   :  { %v1283_v35 = vld.sshfl [vmem:[#allocation1 + $0x20] sm:$0xff pattern:$0x73625140] }
 0x219   :  { %1288 = vst [vmem:[#allocation1 + $0x20] ss:$4 sm:$0xff] %v878_v34 }
 0x21a   :  { %1289 = vst [vmem:[#allocation1 + $0x21] ss:$4 sm:$0xff] %v1048_v33  ;;  %1562 = vperm.xlu2 %1966, %v1283_v35   ;;  %v1712_v33 = vperm.slane %v1518_v31, %v2424_v9 }
 0x21b   :  { %1290 = vst [vmem:[#allocation1 + $0x22] ss:$4 sm:$0xff] %v1049_v23  ;;  %v883_v23 = vmax.f32 %v819_v10, 0.0 }
 0x21c   :  { %1291 = vst [vmem:[#allocation1 + $0x23] ss:$4 sm:$0xff] %v1050_v42  ;;  %v1282_v46 = vld.sshfl [vmem:[#allocation1] sm:$0xff pattern:$0x73625140]  ;;  %v686_v42 = vpop.f32.mrf.mxu1 }
 0x21d   :  { %1284 = vst [vmem:[#allocation1] ss:$4 sm:$0xff] %v877_v32  ;;  %1559 = vperm.xlu1 %1965, %v1282_v46   ;;  %v2430_v32 = vpop.f32.mrf.mxu2  ;;  %v822_v46 = vadd.f32 %v2297_v52, %v686_v42  ;;  %v1064_v47 = vrot.slane %v883_v23, 4  ;;  %v1065_v6 = vrot.slane %v883_v23, 6 }
 0x21e   :  { %1285 = vst [vmem:[#allocation1 + $0x1] ss:$4 sm:$0xff] %v1045_v30 }
 0x21f   :  { %1286 = vst [vmem:[#allocation1 + $0x2] ss:$4 sm:$0xff] %v1046_v40  ;;  %v1515_v27 = vpop.permute.xlu1 %1514  ;;  %v1063_v40 = vrot.slane %v883_v23, 2  ;;  %v886_v50 = vmax.f32 %v822_v46, 0.0 }
 0x220   :  { %1287 = vst [vmem:[#allocation1 + $0x3] ss:$4 sm:$0xff] %v1047_v4  ;;  %v1708_v21 = vperm.slane %v1515_v27, %v2421_v59 }
 0x221   :  { %v1074_v39 = vrot.slane %v886_v50, 6 }
 0x222   :  { %v1710_v34 = vsel %vm1709_vm3, %v1708_v21, %v1706_v54 }
 0x223   :  { %v1293_v53 = vld.sshfl [vmem:[#allocation1 + $0x20] sm:$0xff pattern:$0x73625140]  ;;  %v1714_v30 = vsel %vm1713_vm4, %v1712_v33, %v1710_v34  ;;  %v2463_v34 = vpop.f32.mrf.mxu3  ;;  %v825_v33 = vadd.f32 %v2297_v52, %v2385_v25 }
 0x224   :  { %1298 = vst [vmem:[#allocation1 + $0x20] ss:$4 sm:$0xff] %v880_v48  ;;  %v821_v48 = vadd.f32 %v2297_v52, %v683_v16 }
 0x225   :  { %1299 = vst [vmem:[#allocation1 + $0x21] ss:$4 sm:$0xff] %v1054_v60  ;;  %1568 = vperm.xlu1 %1965, %v1293_v53   ;;  %v2436_v55 = vpop.f32.mrf.mxu2  ;;  %v1073_v60 = vrot.slane %v886_v50, 4  ;;  %v2439_v53 = vadd.s32 4294967256, %v2397_v14 }
 0x226   :  { %1300 = vst [vmem:[#allocation1 + $0x22] ss:$4 sm:$0xff] %v1055_v62  ;;  %v885_v56 = vmax.f32 %v821_v48, 0.0 }
 0x227   :  { %1301 = vst [vmem:[#allocation1 + $0x23] ss:$4 sm:$0xff] %v1056_v26  ;;  %v1292_v3 = vld.sshfl [vmem:[#allocation1] sm:$0xff pattern:$0x73625140]  ;;  %v824_v26 = vadd.f32 %v2297_v52, %v2379_v11  ;;  %v2450_v11 = vadd.s32 4294967240, %v2397_v14 }
 0x228   :  { %1294 = vst [vmem:[#allocation1] ss:$4 sm:$0xff] %v879_v57  ;;  %1565 = vperm.xlu0 %1964, %v1292_v3   ;;  %v1072_v57 = vrot.slane %v886_v50, 2  ;;  %v1069_v2 = vrot.slane %v885_v56, 2  ;;  %v1071_v3 = vrot.slane %v885_v56, 6 }
 0x229   :  { %1295 = vst [vmem:[#allocation1 + $0x1] ss:$4 sm:$0xff] %v1051_v58  ;;  %v1070_v58 = vrot.slane %v885_v56, 4 }
 0x22a   :  { %1296 = vst [vmem:[#allocation1 + $0x2] ss:$4 sm:$0xff] %v1052_v63  ;;  %v823_v63 = vadd.f32 %v2297_v52, %v2371_v0 }
 0x22b   :  { %1297 = vst [vmem:[#allocation1 + $0x3] ss:$4 sm:$0xff] %v1053_v5  ;;  %v888_v5 = vmax.f32 %v824_v26, 0.0  ;;  %v2472_v25 = vpop.f32.mrf.mxu3 }
 0x22d   :  { %v2447_v18 = vpop.f32.mrf.mxu2  ;;  %v1080_v0 = vrot.slane %v888_v5, 6 }
 0x22e   :  { %v1303_v13 = vld.sshfl [vmem:[#allocation1 + $0x20] sm:$0xff pattern:$0x73625140] }
 0x22f   :  { %1308 = vst [vmem:[#allocation1 + $0x20] ss:$4 sm:$0xff] %v882_v7  ;;  %v1521_v62 = vpop.permute.xlu0 %1520  ;;  %v2453_v7 = vadd.s32 4294967248, %v2397_v14 }
 0x230   :  { %1309 = vst [vmem:[#allocation1 + $0x21] ss:$4 sm:$0xff] %v1060_v12  ;;  %1574 = vperm.xlu0 %1964, %v1303_v13   ;;  %v1716_v1 = vperm.slane %v1521_v62, %v2439_v53  ;;  %v887_v13 = vmax.f32 %v823_v63, 0.0  ;;  %v830_v63 = vadd.f32 %v2297_v52, %v2436_v55  ;;  %v829_v55 = vadd.f32 %v2297_v52, %v2430_v32 }
 0x231   :  { %1310 = vst [vmem:[#allocation1 + $0x22] ss:$4 sm:$0xff] %v1061_v15  ;;  %v1078_v15 = vrot.slane %v888_v5, 2 }
 0x232   :  { %1311 = vst [vmem:[#allocation1 + $0x23] ss:$4 sm:$0xff] %v1062_v17  ;;  %v1302_v8 = vld.sshfl [vmem:[#allocation1] sm:$0xff pattern:$0x73625140]  ;;  %v1718_v54 = vsel %vm1717_vm5, %v1716_v1, %v1714_v30  ;;  %v1075_v27 = vrot.slane %v887_v13, 2  ;;  %v828_v30 = vadd.f32 %v2297_v52, %v2417_v45  ;;  %v827_v45 = vadd.f32 %v2297_v52, %v2409_v61 }
 0x233   :  { %1304 = vst [vmem:[#allocation1] ss:$4 sm:$0xff] %v881_v19  ;;  %1571 = vperm.xlu2 %1966, %v1302_v8   ;;  %v1527_v19 = vpop.permute.xlu2 %1526  ;;  %v1076_v10 = vrot.slane %v887_v13, 4  ;;  %v2484_v1 = vadd.s32 4294967224, %v2397_v14 }
 0x234   :  { %1305 = vst [vmem:[#allocation1 + $0x1] ss:$4 sm:$0xff] %v1057_v20  ;;  %v1079_v20 = vrot.slane %v888_v5, 4  ;;  %v1724_v22 = vperm.slane %v1527_v19, %v2450_v11 }
 0x235   :  { %1306 = vst [vmem:[#allocation1 + $0x2] ss:$4 sm:$0xff] %v1058_v24  ;;  %v826_v24 = vadd.f32 %v2297_v52, %v2391_v36  ;;  %v2461_v31 = vpop.f32.mrf.mxu2  ;;  %v889_v36 = vmax.f32 %v825_v33, 0.0 }
 0x236   :  { %1307 = vst [vmem:[#allocation1 + $0x3] ss:$4 sm:$0xff] %v1059_v28 }
 0x237   :  { %v1524_v12 = vpop.permute.xlu1 %1523  ;;  %v1081_v46 = vrot.slane %v889_v36, 2 }
 0x238   :  { %v1720_v17 = vperm.slane %v1524_v12, %v2453_v7 }
 0x239   :  { %v1313_v35 = vld.sshfl [vmem:[#allocation1 + $0x20] sm:$0xff pattern:$0x73625140] }
 0x23a   :  { %1318 = vst [vmem:[#allocation1 + $0x20] ss:$4 sm:$0xff] %v884_v29  ;;  %v1722_v8 = vsel %vm1721_vm6, %v1720_v17, %v1718_v54  ;;  %v1077_v29 = vrot.slane %v887_v13, 6  ;;  %v2487_v54 = vpop.f32.mrf.mxu3 }
 0x23b   :  { %1319 = vst [vmem:[#allocation1 + $0x21] ss:$4 sm:$0xff] %v1066_v41  ;;  %1580 = vperm.xlu2 %1966, %v1313_v35   ;;  %v1726_v21 = vsel %vm1725_vm7, %v1724_v22, %v1722_v8  ;;  %v890_v35 = vmax.f32 %v826_v24, 0.0 }
 0x23c   :  { %1320 = vst [vmem:[#allocation1 + $0x22] ss:$4 sm:$0xff] %v1067_v43 }
 0x23d   :  { %v1312_v4 = vld.sshfl [vmem:[#allocation1] sm:$0xff pattern:$0x73625140]  ;;  %1321 = vst [vmem:[#allocation1 + $0x23] ss:$4 sm:$0xff] %v1068_v44  ;;  %v1085_v42 = vrot.slane %v890_v35, 4 }
 0x23e   :  { %1314 = vst [vmem:[#allocation1] ss:$4 sm:$0xff] %v883_v23  ;;  %1577 = vperm.xlu1 %1965, %v1312_v4   ;;  %v1084_v23 = vrot.slane %v890_v35, 2  ;;  %v1086_v43 = vrot.slane %v890_v35, 6  ;;  %v2470_v44 = vadd.s32 4294967232, %v2397_v14 }
 0x23f   :  { %1315 = vst [vmem:[#allocation1 + $0x1] ss:$4 sm:$0xff] %v1063_v40  ;;  %v1536_v26 = vpop.permute.xlu2 %1535 }
 0x240   :  { %1316 = vst [vmem:[#allocation1 + $0x2] ss:$4 sm:$0xff] %v1064_v47  ;;  %v1082_v47 = vrot.slane %v889_v36, 4 }
 0x241   :  { %1317 = vst [vmem:[#allocation1 + $0x3] ss:$4 sm:$0xff] %v1065_v6  ;;  %v2474_v6 = vpop.f32.mrf.mxu2 }
 0x244   :  { %v1323_v37 = vld.sshfl [vmem:[#allocation1 + $0x20] sm:$0xff pattern:$0x73625140] }
 0x245   :  { %1328 = vst [vmem:[#allocation1 + $0x20] ss:$4 sm:$0xff] %v886_v50  ;;  %v1083_v50 = vrot.slane %v889_v36, 6 }
 0x246   :  { %1329 = vst [vmem:[#allocation1 + $0x21] ss:$4 sm:$0xff] %v1072_v57  ;;  %1586 = vperm.xlu1 %1965, %v1323_v37   ;;  %v892_v37 = vmax.f32 %v828_v30, 0.0  ;;  %v891_v57 = vmax.f32 %v827_v45, 0.0 }
 0x247   :  { %1330 = vst [vmem:[#allocation1 + $0x22] ss:$4 sm:$0xff] %v1073_v60  ;;  %v1530_v4 = vpop.permute.xlu0 %1529  ;;  %v2481_v60 = vadd.s32 4294967216, %v2397_v14 }
 0x248   :  { %v1322_v38 = vld.sshfl [vmem:[#allocation1] sm:$0xff pattern:$0x73625140]  ;;  %1331 = vst [vmem:[#allocation1 + $0x23] ss:$4 sm:$0xff] %v1074_v39  ;;  %v1728_v48 = vperm.slane %v1530_v4, %v2470_v44  ;;  %v1090_v39 = vrot.slane %v892_v37, 2 }
 0x249   :  { %1324 = vst [vmem:[#allocation1] ss:$4 sm:$0xff] %v885_v56  ;;  %1583 = vperm.xlu0 %1964, %v1322_v38   ;;  %v1091_v38 = vrot.slane %v892_v37, 4  ;;  %v722_v12 = vpop.f32.mrf.mxu2  ;;  %v1089_v17 = vrot.slane %v891_v57, 6 }
 0x24a   :  { %1325 = vst [vmem:[#allocation1 + $0x1] ss:$4 sm:$0xff] %v1069_v2  ;;  %v1730_v56 = vsel %vm1729_vm8, %v1728_v48, %v1726_v21  ;;  %v1092_v2 = vrot.slane %v892_v37, 6  ;;  %v832_v21 = vadd.f32 %v2297_v52, %v2461_v31  ;;  %v2512_v48 = vadd.s32 4294967192, %v2397_v14 }
 0x24b   :  { %1326 = vst [vmem:[#allocation1 + $0x2] ss:$4 sm:$0xff] %v1070_v58 }
 0x24c   :  { %1327 = vst [vmem:[#allocation1 + $0x3] ss:$4 sm:$0xff] %v1071_v3  ;;  %v1087_v3 = vrot.slane %v891_v57, 2  ;;  %v896_v31 = vmax.f32 %v832_v21, 0.0 }
 0x24f   :  { %v1333_v16 = vld.sshfl [vmem:[#allocation1 + $0x20] sm:$0xff pattern:$0x73625140]  ;;  %v1533_v61 = vpop.permute.xlu1 %1532 }
 0x250   :  { %1338 = vst [vmem:[#allocation1 + $0x20] ss:$4 sm:$0xff] %v888_v5  ;;  %v1732_v58 = vperm.slane %v1533_v61, %v2484_v1  ;;  %v1736_v5 = vperm.slane %v1536_v26, %v2481_v60 }
 0x251   :  { %1339 = vst [vmem:[#allocation1 + $0x21] ss:$4 sm:$0xff] %v1078_v15  ;;  %1592 = vperm.xlu0 %1964, %v1333_v16   ;;  %v1088_v15 = vrot.slane %v891_v57, 4 }
 0x252   :  { %1340 = vst [vmem:[#allocation1 + $0x22] ss:$4 sm:$0xff] %v1079_v20  ;;  %v894_v20 = vmax.f32 %v830_v63, 0.0  ;;  %v1545_v45 = vpop.permute.xlu2 %1544 }
 0x253   :  { %v1332_v28 = vld.sshfl [vmem:[#allocation1] sm:$0xff pattern:$0x73625140]  ;;  %1341 = vst [vmem:[#allocation1 + $0x23] ss:$4 sm:$0xff] %v1080_v0  ;;  %v893_v0 = vmax.f32 %v829_v55, 0.0  ;;  %v1748_v61 = vperm.slane %v1545_v45, %v2512_v48 }
 0x254   :  { %1334 = vst [vmem:[#allocation1] ss:$4 sm:$0xff] %v887_v13  ;;  %1589 = vperm.xlu2 %1966, %v1332_v28   ;;  %v1734_v13 = vsel %vm1733_vm9, %v1732_v58, %v1730_v56  ;;  %v1096_v22 = vrot.slane %v894_v20, 2  ;;  %v1097_v24 = vrot.slane %v894_v20, 4  ;;  %v1098_v28 = vrot.slane %v894_v20, 6 }
 0x255   :  { %1335 = vst [vmem:[#allocation1 + $0x1] ss:$4 sm:$0xff] %v1075_v27  ;;  %v1738_v16 = vsel %vm1737_vm10, %v1736_v5, %v1734_v13  ;;  %v2496_v27 = vpop.f32.mrf.mxu3  ;;  %v1093_v32 = vrot.slane %v893_v0, 2  ;;  %v1094_v33 = vrot.slane %v893_v0, 4  ;;  %v834_v56 = vadd.f32 %v2297_v52, %v722_v12 }
 0x256   :  { %1336 = vst [vmem:[#allocation1 + $0x2] ss:$4 sm:$0xff] %v1076_v10  ;;  %v2500_v10 = vpop.f32.mrf.mxu2  ;;  %v2528_v12 = vadd.s32 4294967184, %v2397_v14 }
 0x257   :  { %1337 = vst [vmem:[#allocation1 + $0x3] ss:$4 sm:$0xff] %v1077_v29  ;;  %v898_v63 = vmax.f32 %v834_v56, 0.0 }
 0x25a   :  { %v1343_v41 = vld.sshfl [vmem:[#allocation1 + $0x20] sm:$0xff pattern:$0x73625140] }
 0x25b   :  { %1348 = vst [vmem:[#allocation1 + $0x20] ss:$4 sm:$0xff] %v890_v35  ;;  %v2503_v35 = vadd.s32 4294967208, %v2397_v14 }
 0x25c   :  { %1349 = vst [vmem:[#allocation1 + $0x21] ss:$4 sm:$0xff] %v1084_v23  ;;  %1598 = vperm.xlu2 %1966, %v1343_v41   ;;  %v831_v41 = vadd.f32 %v2297_v52, %v2447_v18 }
 0x25d   :  { %1350 = vst [vmem:[#allocation1 + $0x22] ss:$4 sm:$0xff] %v1085_v42  ;;  %v2509_v4 = vpop.f32.mrf.mxu3 }
 0x25e   :  { %v1342_v40 = vld.sshfl [vmem:[#allocation1] sm:$0xff pattern:$0x73625140]  ;;  %1351 = vst [vmem:[#allocation1 + $0x23] ss:$4 sm:$0xff] %v1086_v43  ;;  %v895_v30 = vmax.f32 %v831_v41, 0.0  ;;  %v728_v18 = vpop.f32.mrf.mxu2  ;;  %v835_v41 = vadd.f32 %v2297_v52, %v2500_v10 }
 0x25f   :  { %1344 = vst [vmem:[#allocation1] ss:$4 sm:$0xff] %v889_v36  ;;  %1595 = vperm.xlu1 %1965, %v1342_v40   ;;  %v1095_v36 = vrot.slane %v893_v0, 6  ;;  %v1539_v23 = vpop.permute.xlu0 %1538  ;;  %v836_v21 = vadd.f32 %v2297_v52, %v728_v18 }
 0x260   :  { %1345 = vst [vmem:[#allocation1 + $0x1] ss:$4 sm:$0xff] %v1081_v46  ;;  %v1740_v42 = vperm.slane %v1539_v23, %v2503_v35  ;;  %v1102_v46 = vrot.slane %v896_v31, 2 }
 0x261   :  { %1346 = vst [vmem:[#allocation1 + $0x2] ss:$4 sm:$0xff] %v1082_v47  ;;  %v1103_v47 = vrot.slane %v896_v31, 4 }
 0x262   :  { %1347 = vst [vmem:[#allocation1 + $0x3] ss:$4 sm:$0xff] %v1083_v50  ;;  %v1742_v43 = vsel %vm1741_vm11, %v1740_v42, %v1738_v16  ;;  %v1104_v50 = vrot.slane %v896_v31, 6 }
 0x265   :  { %v1353_v62 = vld.sshfl [vmem:[#allocation1 + $0x20] sm:$0xff pattern:$0x73625140] }
 0x266   :  { %1358 = vst [vmem:[#allocation1 + $0x20] ss:$4 sm:$0xff] %v892_v37  ;;  %v2515_v37 = vadd.s32 4294967200, %v2397_v14 }
 0x267   :  { %1359 = vst [vmem:[#allocation1 + $0x21] ss:$4 sm:$0xff] %v1090_v39  ;;  %1604 = vperm.xlu1 %1965, %v1353_v62   ;;  %v1099_v39 = vrot.slane %v895_v30, 2 }
 0x268   :  { %1360 = vst [vmem:[#allocation1 + $0x22] ss:$4 sm:$0xff] %v1091_v38  ;;  %v1100_v38 = vrot.slane %v895_v30, 4 }
 0x269   :  { %v1352_v19 = vld.sshfl [vmem:[#allocation1] sm:$0xff pattern:$0x73625140]  ;;  %1361 = vst [vmem:[#allocation1 + $0x23] ss:$4 sm:$0xff] %v1092_v2  ;;  %v1101_v2 = vrot.slane %v895_v30, 6 }
 0x26a   :  { %1354 = vst [vmem:[#allocation1] ss:$4 sm:$0xff] %v891_v57  ;;  %1601 = vperm.xlu0 %1964, %v1352_v19   ;;  %v2525_v19 = vadd.s32 4294967176, %v2397_v14 }
 0x26b   :  { %1355 = vst [vmem:[#allocation1 + $0x1] ss:$4 sm:$0xff] %v1087_v3  ;;  %v1542_v57 = vpop.permute.xlu1 %1541  ;;  %v833_v3 = vadd.f32 %v2297_v52, %v2474_v6 }
 0x26c   :  { %1356 = vst [vmem:[#allocation1 + $0x2] ss:$4 sm:$0xff] %v1088_v15  ;;  %v1744_v26 = vperm.slane %v1542_v57, %v2515_v37  ;;  %v2530_v15 = vpop.f32.mrf.mxu3  ;;  %v1554_v42 = vpop.permute.xlu2 %1553 }
 0x26d   :  { %1357 = vst [vmem:[#allocation1 + $0x3] ss:$4 sm:$0xff] %v1089_v17  ;;  %v897_v16 = vmax.f32 %v833_v3, 0.0  ;;  %v1108_v17 = vrot.slane %v898_v63, 2 }
 0x26e   :  { %v1746_v58 = vsel %vm1745_vm12, %v1744_v26, %v1742_v43 }
 0x26f   :  { %v1750_v5 = vsel %vm1749_vm13, %v1748_v61, %v1746_v58  ;;  %v1107_v23 = vrot.slane %v897_v16, 6 }
 0x270   :  { %v1363_v8 = vld.sshfl [vmem:[#allocation1 + $0x20] sm:$0xff pattern:$0x73625140] }
 0x271   :  { %1368 = vst [vmem:[#allocation1 + $0x20] ss:$4 sm:$0xff] %v894_v20 }
 0x272   :  { %1369 = vst [vmem:[#allocation1 + $0x21] ss:$4 sm:$0xff] %v1096_v22  ;;  %1610 = vperm.xlu0 %1964, %v1363_v8   ;;  %v731_v22 = vpop.f32.mrf.mxu2 }
 0x273   :  { %1370 = vst [vmem:[#allocation1 + $0x22] ss:$4 sm:$0xff] %v1097_v24  ;;  %v1110_v24 = vrot.slane %v898_v63, 6 }
 0x274   :  { %v1362_v29 = vld.sshfl [vmem:[#allocation1] sm:$0xff pattern:$0x73625140]  ;;  %1371 = vst [vmem:[#allocation1 + $0x23] ss:$4 sm:$0xff] %v1098_v28 }
 0x275   :  { %1364 = vst [vmem:[#allocation1] ss:$4 sm:$0xff] %v893_v0  ;;  %1607 = vperm.xlu2 %1966, %v1362_v29   ;;  %v1551_v20 = vpop.permute.xlu1 %1550  ;;  %v1109_v0 = vrot.slane %v898_v63, 4  ;;  %v1105_v29 = vrot.slane %v897_v16, 2 }
 0x276   :  { %1365 = vst [vmem:[#allocation1 + $0x1] ss:$4 sm:$0xff] %v1093_v32  ;;  %v1756_v8 = vperm.slane %v1551_v20, %v2525_v19 }
 0x277   :  { %1366 = vst [vmem:[#allocation1 + $0x2] ss:$4 sm:$0xff] %v1094_v33 }
 0x278   :  { %1367 = vst [vmem:[#allocation1 + $0x3] ss:$4 sm:$0xff] %v1095_v36  ;;  %v1106_v36 = vrot.slane %v897_v16, 4 }
 0x279   :  { %v1548_v13 = vpop.permute.xlu0 %1547 }
 0x27a   :  { %v1752_v6 = vperm.slane %v1548_v13, %v2528_v12  ;;  %v734_v45 = vpop.f32.mrf.mxu2 }
 0x27b   :  { %v1373_v40 = vld.sshfl [vmem:[#allocation1 + $0x20] sm:$0xff pattern:$0x73625140]  ;;  %v838_v10 = vadd.f32 %v2297_v52, %v734_v45 }
 0x27c   :  { %1378 = vst [vmem:[#allocation1 + $0x20] ss:$4 sm:$0xff] %v896_v31  ;;  %v1754_v28 = vsel %vm1753_vm14, %v1752_v6, %v1750_v5  ;;  %v900_v31 = vmax.f32 %v836_v21, 0.0 }
 0x27d   :  { %1379 = vst [vmem:[#allocation1 + $0x21] ss:$4 sm:$0xff] %v1102_v46  ;;  %1616 = vperm.xlu2 %1966, %v1373_v40   ;;  %v2537_v32 = vsel %vm1757_vm15, %v1756_v8, %v1754_v28  ;;  %v1759_v46 = vperm.slane %v1554_v42, %v2397_v14  ;;  %v902_v58 = vmax.f32 %v838_v10, 0.0 }
 0x27e   :  { %1380 = vst [vmem:[#allocation1 + $0x22] ss:$4 sm:$0xff] %v1103_v47  ;;  %v1114_v18 = vrot.slane %v900_v31, 2  ;;  %v1115_v56 = vrot.slane %v900_v31, 4 }
 0x27f   :  { %v1372_v62 = vld.sshfl [vmem:[#allocation1] sm:$0xff pattern:$0x73625140]  ;;  %1381 = vst [vmem:[#allocation1 + $0x23] ss:$4 sm:$0xff] %v1104_v50  ;;  %v899_v50 = vmax.f32 %v835_v41, 0.0 }
 0x280   :  { %1374 = vst [vmem:[#allocation1] ss:$4 sm:$0xff] %v895_v30  ;;  %1613 = vperm.xlu1 %1965, %v1372_v62   ;;  %v2541_v30 = vpop.f32.mrf.mxu3  ;;  %v1122_v6 = vrot.slane %v902_v58, 6 }
 0x281   :  { %1375 = vst [vmem:[#allocation1 + $0x1] ss:$4 sm:$0xff] %v1099_v39  ;;  %v1557_v43 = vpop.permute.xlu0 %1556  ;;  %v1116_v39 = vrot.slane %v900_v31, 6  ;;  %v1111_v26 = vrot.slane %v899_v50, 2  ;;  %v1113_v61 = vrot.slane %v899_v50, 6 }
 0x282   :  { %1376 = vst [vmem:[#allocation1 + $0x2] ss:$4 sm:$0xff] %v1100_v38  ;;  %v1760_v40 = vperm.slane %v1557_v43, %v2402_v49  ;;  %v1112_v38 = vrot.slane %v899_v50, 4  ;;  %v737_v28 = vpop.f32.mrf.mxu2 }
 0x283   :  { %1377 = vst [vmem:[#allocation1 + $0x3] ss:$4 sm:$0xff] %v1101_v2  ;;  %v837_v2 = vadd.f32 %v2297_v52, %v731_v22  ;;  %v840_v22 = vadd.f32 %v2297_v52, %v2463_v34 }
 0x284   :  { %v1761_v57 = vsel %vm1701_vm1, %v1760_v40, %v1759_v46 }
 0x286   :  { %v1383_v55 = vld.sshfl [vmem:[#allocation1 + $0x20] sm:$0xff pattern:$0x73625140] }
 0x287   :  { %1388 = vst [vmem:[#allocation1 + $0x20] ss:$4 sm:$0xff] %v898_v63 }
 0x288   :  { %1389 = vst [vmem:[#allocation1 + $0x21] ss:$4 sm:$0xff] %v1108_v17  ;;  %1622 = vperm.xlu1 %1965, %v1383_v55   ;;  %v2548_v3 = vpop.f32.mrf.mxu3  ;;  %v1120_v17 = vrot.slane %v902_v58, 2  ;;  %v1121_v55 = vrot.slane %v902_v58, 4 }
 0x289   :  { %1390 = vst [vmem:[#allocation1 + $0x22] ss:$4 sm:$0xff] %v1109_v0  ;;  %v1563_v0 = vpop.permute.xlu2 %1562 }
 0x28a   :  { %v1382_v33 = vld.sshfl [vmem:[#allocation1] sm:$0xff pattern:$0x73625140]  ;;  %1391 = vst [vmem:[#allocation1 + $0x23] ss:$4 sm:$0xff] %v1110_v24 }
 0x28b   :  { %1384 = vst [vmem:[#allocation1] ss:$4 sm:$0xff] %v897_v16  ;;  %1619 = vperm.xlu0 %1964, %v1382_v33   ;;  %v901_v16 = vmax.f32 %v837_v2, 0.0 }
 0x28c   :  { %1385 = vst [vmem:[#allocation1 + $0x1] ss:$4 sm:$0xff] %v1105_v29  ;;  %v1764_v29 = vperm.slane %v1563_v0, %v2421_v59 }
 0x28d   :  { %1386 = vst [vmem:[#allocation1 + $0x2] ss:$4 sm:$0xff] %v1106_v36  ;;  %v1117_v24 = vrot.slane %v901_v16, 2  ;;  %v1118_v21 = vrot.slane %v901_v16, 4  ;;  %v1119_v33 = vrot.slane %v901_v16, 6  ;;  %v904_v36 = vmax.f32 %v840_v22, 0.0 }
 0x28e   :  { %1387 = vst [vmem:[#allocation1 + $0x3] ss:$4 sm:$0xff] %v1107_v23  ;;  %v839_v23 = vadd.f32 %v2297_v52, %v737_v28 }
 0x28f   :  { %v1560_v63 = vpop.permute.xlu1 %1559  ;;  %v1126_v40 = vrot.slane %v904_v36, 2 }
 0x290   :  { %v1762_v5 = vperm.slane %v1560_v63, %v2405_v51 }
 0x291   :  { %v1393_v47 = vld.sshfl [vmem:[#allocation1 + $0x20] sm:$0xff pattern:$0x73625140]  ;;  %v1572_v10 = vpop.permute.xlu2 %1571 }
 0x292   :  { %1398 = vst [vmem:[#allocation1 + $0x20] ss:$4 sm:$0xff] %v900_v31  ;;  %v1763_v20 = vsel %vm1705_vm2, %v1762_v5, %v1761_v57  ;;  %v2557_v31 = vpop.f32.mrf.mxu3  ;;  %v1770_v2 = vperm.slane %v1572_v10, %v2453_v7  ;;  %v845_v10 = vadd.f32 %v2297_v52, %v2530_v15 }
 0x293   :  { %1399 = vst [vmem:[#allocation1 + $0x21] ss:$4 sm:$0xff] %v1114_v18  ;;  %1628 = vperm.xlu0 %1964, %v1393_v47   ;;  %v1765_v41 = vsel %vm1709_vm3, %v1764_v29, %v1763_v20  ;;  %v903_v47 = vmax.f32 %v839_v23, 0.0  ;;  %v1127_v18 = vrot.slane %v904_v36, 4 }
 0x294   :  { %1400 = vst [vmem:[#allocation1 + $0x22] ss:$4 sm:$0xff] %v1115_v56  ;;  %v1128_v56 = vrot.slane %v904_v36, 6 }
 0x295   :  { %v1392_v62 = vld.sshfl [vmem:[#allocation1] sm:$0xff pattern:$0x73625140]  ;;  %1401 = vst [vmem:[#allocation1 + $0x23] ss:$4 sm:$0xff] %v1116_v39  ;;  %v842_v39 = vadd.f32 %v2297_v52, %v2487_v54 }
 0x296   :  { %1394 = vst [vmem:[#allocation1] ss:$4 sm:$0xff] %v899_v50  ;;  %1625 = vperm.xlu2 %1966, %v1392_v62   ;;  %v1123_v62 = vrot.slane %v903_v47, 2 }
 0x297   :  { %1395 = vst [vmem:[#allocation1 + $0x1] ss:$4 sm:$0xff] %v1111_v26  ;;  %v1569_v34 = vpop.permute.xlu1 %1568  ;;  %v906_v63 = vmax.f32 %v842_v39, 0.0 }
 0x298   :  { %1396 = vst [vmem:[#allocation1 + $0x2] ss:$4 sm:$0xff] %v1112_v38  ;;  %v1768_v43 = vperm.slane %v1569_v34, %v2439_v53  ;;  %v1124_v38 = vrot.slane %v903_v47, 4 }
 0x299   :  { %1397 = vst [vmem:[#allocation1 + $0x3] ss:$4 sm:$0xff] %v1113_v61  ;;  %v1125_v61 = vrot.slane %v903_v47, 6  ;;  %v1134_v22 = vrot.slane %v906_v63, 6 }
 0x29a   :  { %v1566_v42 = vpop.permute.xlu0 %1565  ;;  %v2568_v5 = vpop.f32.mrf.mxu3 }
 0x29b   :  { %v1766_v46 = vperm.slane %v1566_v42, %v2424_v9 }
 0x29c   :  { %v1403_v13 = vld.sshfl [vmem:[#allocation1 + $0x20] sm:$0xff pattern:$0x73625140] }
 0x29d   :  { %1408 = vst [vmem:[#allocation1 + $0x20] ss:$4 sm:$0xff] %v902_v58  ;;  %v1767_v45 = vsel %vm1713_vm4, %v1766_v46, %v1765_v41  ;;  %v841_v58 = vadd.f32 %v2297_v52, %v2472_v25  ;;  %v844_v25 = vadd.f32 %v2297_v52, %v2509_v4 }
 0x29e   :  { %1409 = vst [vmem:[#allocation1 + $0x21] ss:$4 sm:$0xff] %v1120_v17  ;;  %1634 = vperm.xlu2 %1966, %v1403_v13   ;;  %v1769_v57 = vsel %vm1717_vm5, %v1768_v43, %v1767_v45 }
 0x29f   :  { %1410 = vst [vmem:[#allocation1 + $0x22] ss:$4 sm:$0xff] %v1121_v55  ;;  %v1771_v54 = vsel %vm1721_vm6, %v1770_v2, %v1769_v57  ;;  %v905_v17 = vmax.f32 %v841_v58, 0.0  ;;  %v1132_v55 = vrot.slane %v906_v63, 2  ;;  %v909_v58 = vmax.f32 %v845_v10, 0.0 }
 0x2a0   :  { %v1402_v8 = vld.sshfl [vmem:[#allocation1] sm:$0xff pattern:$0x73625140]  ;;  %1411 = vst [vmem:[#allocation1 + $0x23] ss:$4 sm:$0xff] %v1122_v6  ;;  %v1133_v6 = vrot.slane %v906_v63, 4 }
 0x2a1   :  { %1404 = vst [vmem:[#allocation1] ss:$4 sm:$0xff] %v901_v16  ;;  %1631 = vperm.xlu1 %1965, %v1402_v8   ;;  %v1129_v8 = vrot.slane %v905_v17, 2  ;;  %v1130_v28 = vrot.slane %v905_v17, 4 }
 0x2a2   :  { %1405 = vst [vmem:[#allocation1 + $0x1] ss:$4 sm:$0xff] %v1117_v24  ;;  %v1575_v13 = vpop.permute.xlu0 %1574  ;;  %v2575_v29 = vpop.f32.mrf.mxu3 }
 0x2a3   :  { %1406 = vst [vmem:[#allocation1 + $0x2] ss:$4 sm:$0xff] %v1118_v21  ;;  %v1772_v16 = vperm.slane %v1575_v13, %v2450_v11  ;;  %v1131_v21 = vrot.slane %v905_v17, 6 }
 0x2a4   :  { %1407 = vst [vmem:[#allocation1 + $0x3] ss:$4 sm:$0xff] %v1119_v33  ;;  %v843_v33 = vadd.f32 %v2297_v52, %v2496_v27  ;;  %v846_v27 = vadd.f32 %v2297_v52, %v2541_v30 }
 0x2a5   :  { %v1773_v0 = vsel %vm1725_vm7, %v1772_v16, %v1771_v54 }
 0x2a6   :  { %v907_v41 = vmax.f32 %v843_v33, 0.0 }
 0x2a7   :  { %v1413_v50 = vld.sshfl [vmem:[#allocation1 + $0x20] sm:$0xff pattern:$0x73625140] }
 0x2a8   :  { %1418 = vst [vmem:[#allocation1 + $0x20] ss:$4 sm:$0xff] %v904_v36  ;;  %v908_v36 = vmax.f32 %v844_v25, 0.0  ;;  %v1136_v45 = vrot.slane %v907_v41, 4  ;;  %v1137_v39 = vrot.slane %v907_v41, 6  ;;  %v1142_v25 = vrot.slane %v909_v58, 4 }
 0x2a9   :  { %1640 = vperm.xlu1 %1965, %v1413_v50   ;;  %1419 = vst [vmem:[#allocation1 + $0x21] ss:$4 sm:$0xff] %v1126_v40  ;;  %v1135_v50 = vrot.slane %v907_v41, 2 }
 0x2aa   :  { %1420 = vst [vmem:[#allocation1 + $0x22] ss:$4 sm:$0xff] %v1127_v18  ;;  %v1138_v34 = vrot.slane %v908_v36, 2  ;;  %v1139_v43 = vrot.slane %v908_v36, 4  ;;  %v1140_v40 = vrot.slane %v908_v36, 6 }
 0x2ab   :  { %1421 = vst [vmem:[#allocation1 + $0x23] ss:$4 sm:$0xff] %v1128_v56  ;;  %v1412_v26 = vld.sshfl [vmem:[#allocation1] sm:$0xff pattern:$0x73625140]  ;;  %v2583_v56 = vpop.f32.mrf.mxu3 }
 0x2ac   :  { %1637 = vperm.xlu0 %1964, %v1412_v26   ;;  %1414 = vst [vmem:[#allocation1] ss:$4 sm:$0xff] %v903_v47  ;;  %v1581_v47 = vpop.permute.xlu2 %1580 }
 0x2ad   :  { %1415 = vst [vmem:[#allocation1 + $0x1] ss:$4 sm:$0xff] %v1123_v62  ;;  %v1776_v57 = vperm.slane %v1581_v47, %v2484_v1  ;;  %v910_v62 = vmax.f32 %v846_v27, 0.0 }
 0x2ae   :  { %1416 = vst [vmem:[#allocation1 + $0x2] ss:$4 sm:$0xff] %v1124_v38 }
 0x2af   :  { %1417 = vst [vmem:[#allocation1 + $0x3] ss:$4 sm:$0xff] %v1125_v61  ;;  %v1145_v13 = vrot.slane %v910_v62, 4 }
 0x2b0   :  { %v1578_v23 = vpop.permute.xlu1 %1577 }
 0x2b1   :  { %v1774_v4 = vperm.slane %v1578_v23, %v2470_v44 }
 0x2b2   :  { %v1423_v20 = vld.sshfl [vmem:[#allocation1 + $0x20] sm:$0xff pattern:$0x73625140] }
 0x2b3   :  { %1428 = vst [vmem:[#allocation1 + $0x20] ss:$4 sm:$0xff] %v906_v63  ;;  %v1775_v46 = vsel %vm1729_vm8, %v1774_v4, %v1773_v0  ;;  %v1144_v63 = vrot.slane %v910_v62, 2  ;;  %v776_v0 = vpop.f32.mrf.mxu3 }
 0x2b4   :  { %1646 = vperm.xlu0 %1964, %v1423_v20   ;;  %1429 = vst [vmem:[#allocation1 + $0x21] ss:$4 sm:$0xff] %v1132_v55  ;;  %v1777_v30 = vsel %vm1733_vm9, %v1776_v57, %v1775_v46  ;;  %v848_v55 = vadd.f32 %v2297_v52, %v2557_v31  ;;  %v1590_v20 = vpop.permute.xlu2 %1589 }
 0x2b5   :  { %1430 = vst [vmem:[#allocation1 + $0x22] ss:$4 sm:$0xff] %v1133_v6  ;;  %v1141_v6 = vrot.slane %v909_v58, 2 }
 0x2b6   :  { %1431 = vst [vmem:[#allocation1 + $0x23] ss:$4 sm:$0xff] %v1134_v22  ;;  %v1422_v24 = vld.sshfl [vmem:[#allocation1] sm:$0xff pattern:$0x73625140] }
 0x2b7   :  { %1643 = vperm.xlu2 %1966, %v1422_v24   ;;  %1424 = vst [vmem:[#allocation1] ss:$4 sm:$0xff] %v905_v17  ;;  %v1146_v17 = vrot.slane %v910_v62, 6  ;;  %v1782_v24 = vperm.slane %v1590_v20, %v2515_v37 }
 0x2b8   :  { %1425 = vst [vmem:[#allocation1 + $0x1] ss:$4 sm:$0xff] %v1129_v8  ;;  %v1587_v26 = vpop.permute.xlu1 %1586  ;;  %v1143_v8 = vrot.slane %v909_v58, 6 }
 0x2b9   :  { %1426 = vst [vmem:[#allocation1 + $0x2] ss:$4 sm:$0xff] %v1130_v28  ;;  %v1780_v61 = vperm.slane %v1587_v26, %v2503_v35  ;;  %v847_v28 = vadd.f32 %v2297_v52, %v2548_v3  ;;  %v850_v3 = vadd.f32 %v2297_v52, %v2575_v29 }
 0x2ba   :  { %1427 = vst [vmem:[#allocation1 + $0x3] ss:$4 sm:$0xff] %v1131_v21  ;;  %v912_v21 = vmax.f32 %v848_v55, 0.0 }
 0x2bb   :  { %v1584_v38 = vpop.permute.xlu0 %1583  ;;  %v911_v23 = vmax.f32 %v847_v28, 0.0  ;;  %v2603_v46 = vpop.f32.mrf.mxu3 }
 0x2bc   :  { %v1778_v2 = vperm.slane %v1584_v38, %v2481_v60  ;;  %v1150_v4 = vrot.slane %v912_v21, 2  ;;  %v1599_v57 = vpop.permute.xlu2 %1598 }
 0x2bd   :  { %v1433_v42 = vld.sshfl [vmem:[#allocation1 + $0x20] sm:$0xff pattern:$0x73625140]  ;;  %v1148_v27 = vrot.slane %v911_v23, 4 }
 0x2be   :  { %1438 = vst [vmem:[#allocation1 + $0x20] ss:$4 sm:$0xff] %v908_v36  ;;  %v1779_v16 = vsel %vm1737_vm10, %v1778_v2, %v1777_v30  ;;  %v1788_v30 = vperm.slane %v1599_v57, %v2525_v19 }
 0x2bf   :  { %1652 = vperm.xlu2 %1966, %v1433_v42   ;;  %1439 = vst [vmem:[#allocation1 + $0x21] ss:$4 sm:$0xff] %v1138_v34  ;;  %v1781_v15 = vsel %vm1741_vm11, %v1780_v61, %v1779_v16  ;;  %v1151_v34 = vrot.slane %v912_v21, 4 }
 0x2c0   :  { %1440 = vst [vmem:[#allocation1 + $0x22] ss:$4 sm:$0xff] %v1139_v43  ;;  %v1783_v31 = vsel %vm1745_vm12, %v1782_v24, %v1781_v15  ;;  %v1152_v43 = vrot.slane %v912_v21, 6  ;;  %v851_v15 = vadd.f32 %v2297_v52, %v2583_v56 }
 0x2c1   :  { %v1432_v18 = vld.sshfl [vmem:[#allocation1] sm:$0xff pattern:$0x73625140]  ;;  %1441 = vst [vmem:[#allocation1 + $0x23] ss:$4 sm:$0xff] %v1140_v40  ;;  %v1147_v40 = vrot.slane %v911_v23, 2 }
 0x2c2   :  { %1649 = vperm.xlu1 %1965, %v1432_v18   ;;  %1434 = vst [vmem:[#allocation1] ss:$4 sm:$0xff] %v907_v41  ;;  %v849_v18 = vadd.f32 %v2297_v52, %v2568_v5 }
 0x2c3   :  { %1435 = vst [vmem:[#allocation1 + $0x1] ss:$4 sm:$0xff] %v1135_v50  ;;  %v1593_v33 = vpop.permute.xlu0 %1592  ;;  %v1149_v50 = vrot.slane %v911_v23, 6 }
 0x2c4   :  { %1436 = vst [vmem:[#allocation1 + $0x2] ss:$4 sm:$0xff] %v1136_v45  ;;  %v1784_v36 = vperm.slane %v1593_v33, %v2512_v48  ;;  %v914_v45 = vmax.f32 %v850_v3, 0.0  ;;  %v913_v10 = vmax.f32 %v849_v18, 0.0 }
 0x2c5   :  { %1437 = vst [vmem:[#allocation1 + $0x3] ss:$4 sm:$0xff] %v1137_v39 }
 0x2c6   :  { %v1785_v42 = vsel %vm1749_vm13, %v1784_v36, %v1783_v31  ;;  %v1157_v38 = vrot.slane %v914_v45, 4  ;;  %v1158_v2 = vrot.slane %v914_v45, 6  ;;  %v1154_v16 = vrot.slane %v913_v10, 4 }
 0x2c8   :  { %v1443_v54 = vld.sshfl [vmem:[#allocation1 + $0x20] sm:$0xff pattern:$0x73625140] }
 0x2c9   :  { %1448 = vst [vmem:[#allocation1 + $0x20] ss:$4 sm:$0xff] %v910_v62  ;;  %v1156_v62 = vrot.slane %v914_v45, 2 }
 0x2ca   :  { %1658 = vperm.xlu1 %1965, %v1443_v54   ;;  %1449 = vst [vmem:[#allocation1 + $0x21] ss:$4 sm:$0xff] %v1144_v63  ;;  %v852_v63 = vadd.f32 %v2297_v52, %v776_v0  ;;  %v1153_v54 = vrot.slane %v913_v10, 2 }
 0x2cb   :  { %1450 = vst [vmem:[#allocation1 + $0x22] ss:$4 sm:$0xff] %v1145_v13 }
 0x2cc   :  { %v1442_v22 = vld.sshfl [vmem:[#allocation1] sm:$0xff pattern:$0x73625140]  ;;  %1451 = vst [vmem:[#allocation1 + $0x23] ss:$4 sm:$0xff] %v1146_v17  ;;  %v1155_v17 = vrot.slane %v913_v10, 6 }
 0x2cd   :  { %1655 = vperm.xlu0 %1964, %v1442_v22   ;;  %1444 = vst [vmem:[#allocation1] ss:$4 sm:$0xff] %v909_v58  ;;  %v782_v58 = vpop.f32.mrf.mxu3  ;;  %v916_v55 = vmax.f32 %v852_v63, 0.0 }
 0x2ce   :  { %1445 = vst [vmem:[#allocation1 + $0x1] ss:$4 sm:$0xff] %v1141_v6  ;;  %v854_v56 = vadd.f32 %v2297_v52, %v782_v58 }
 0x2cf   :  { %1446 = vst [vmem:[#allocation1 + $0x2] ss:$4 sm:$0xff] %v1142_v25  ;;  %v915_v25 = vmax.f32 %v851_v15, 0.0  ;;  %v1163_v28 = vrot.slane %v916_v55, 4  ;;  %v1164_v33 = vrot.slane %v916_v55, 6 }
 0x2d0   :  { %1447 = vst [vmem:[#allocation1 + $0x3] ss:$4 sm:$0xff] %v1143_v8  ;;  %v1162_v8 = vrot.slane %v916_v55, 2 }
 0x2d1   :  { %v1596_v39 = vpop.permute.xlu1 %1595  ;;  %v1159_v36 = vrot.slane %v915_v25, 2 }
 0x2d2   :  { %v1786_v29 = vperm.slane %v1596_v39, %v2528_v12 }
 0x2d3   :  { %v1453_v41 = vld.sshfl [vmem:[#allocation1 + $0x20] sm:$0xff pattern:$0x73625140] }
 0x2d4   :  { %1458 = vst [vmem:[#allocation1 + $0x20] ss:$4 sm:$0xff] %v912_v21  ;;  %v1787_v61 = vsel %vm1753_vm14, %v1786_v29, %v1785_v42  ;;  %v918_v42 = vmax.f32 %v854_v56, 0.0 }
 0x2d5   :  { %1664 = vperm.xlu0 %1964, %v1453_v41   ;;  %1459 = vst [vmem:[#allocation1 + $0x21] ss:$4 sm:$0xff] %v1150_v4  ;;  %v2611_v5 = vsel %vm1757_vm15, %v1788_v30, %v1787_v61  ;;  %v785_v21 = vpop.f32.mrf.mxu3  ;;  %v1160_v4 = vrot.slane %v915_v25, 4  ;;  %v1161_v41 = vrot.slane %v915_v25, 6 }
 0x2d6   :  { %1460 = vst [vmem:[#allocation1 + $0x22] ss:$4 sm:$0xff] %v1151_v34  ;;  %v853_v34 = vadd.f32 %v2297_v52, %v2603_v46  ;;  %v1168_v3 = vrot.slane %v918_v42, 2  ;;  %v855_v29 = vadd.f32 %v2297_v52, %v785_v21 }
 0x2d7   :  { %v1452_v47 = vld.sshfl [vmem:[#allocation1] sm:$0xff pattern:$0x73625140]  ;;  %1461 = vst [vmem:[#allocation1 + $0x23] ss:$4 sm:$0xff] %v1152_v43 }
 0x2d8   :  { %1661 = vperm.xlu2 %1966, %v1452_v47   ;;  %1454 = vst [vmem:[#allocation1] ss:$4 sm:$0xff] %v911_v23  ;;  %v917_v43 = vmax.f32 %v853_v34, 0.0 }
 0x2d9   :  { %1455 = vst [vmem:[#allocation1 + $0x1] ss:$4 sm:$0xff] %v1147_v40  ;;  %v1605_v20 = vpop.permute.xlu1 %1604 }
 0x2da   :  { %1456 = vst [vmem:[#allocation1 + $0x2] ss:$4 sm:$0xff] %v1148_v27  ;;  %v1791_v22 = vperm.slane %v1605_v20, %v2402_v49  ;;  %v1169_v27 = vrot.slane %v918_v42, 4  ;;  %v1166_v39 = vrot.slane %v917_v43, 4  ;;  %v1167_v46 = vrot.slane %v917_v43, 6 }
 0x2db   :  { %1457 = vst [vmem:[#allocation1 + $0x3] ss:$4 sm:$0xff] %v1149_v50  ;;  %v1170_v50 = vrot.slane %v918_v42, 6 }
 0x2dc   :  { %v1602_v6 = vpop.permute.xlu0 %1601 }
 0x2dd   :  { %v1790_v0 = vperm.slane %v1602_v6, %v2397_v14  ;;  %v788_v40 = vpop.f32.mrf.mxu3 }
 0x2de   :  { %v1463_v26 = vld.sshfl [vmem:[#allocation1 + $0x20] sm:$0xff pattern:$0x73625140]  ;;  %v856_v18 = vadd.f32 %v2297_v52, %v788_v40 }
 0x2df   :  { %1468 = vst [vmem:[#allocation1 + $0x20] ss:$4 sm:$0xff] %v914_v45  ;;  %v2619_v31 = vsel %vm1701_vm1, %v1791_v22, %v1790_v0  ;;  %v1165_v45 = vrot.slane %v917_v43, 2 }
 0x2e0   :  { %1670 = vperm.xlu2 %1966, %v1463_v26   ;;  %1469 = vst [vmem:[#allocation1 + $0x21] ss:$4 sm:$0xff] %v1156_v62  ;;  %v919_v62 = vmax.f32 %v855_v29, 0.0  ;;  %v1608_v26 = vpop.permute.xlu2 %1607 }
 0x2e1   :  { %1470 = vst [vmem:[#allocation1 + $0x22] ss:$4 sm:$0xff] %v1157_v38  ;;  %v1793_v22 = vperm.slane %v1608_v26, %v2405_v51 }
 0x2e2   :  { %v1462_v13 = vld.sshfl [vmem:[#allocation1] sm:$0xff pattern:$0x73625140]  ;;  %1471 = vst [vmem:[#allocation1 + $0x23] ss:$4 sm:$0xff] %v1158_v2  ;;  %v1171_v63 = vrot.slane %v919_v62, 2 }
 0x2e3   :  { %1667 = vperm.xlu1 %1965, %v1462_v13   ;;  %1464 = vst [vmem:[#allocation1] ss:$4 sm:$0xff] %v913_v10  ;;  %v920_v10 = vmax.f32 %v856_v18, 0.0  ;;  %v1172_v13 = vrot.slane %v919_v62, 4 }
 0x2e4   :  { %1465 = vst [vmem:[#allocation1 + $0x1] ss:$4 sm:$0xff] %v1153_v54  ;;  %v1611_v52 = vpop.permute.xlu0 %1610 }
 0x2e5   :  { %1466 = vst [vmem:[#allocation1 + $0x2] ss:$4 sm:$0xff] %v1154_v16  ;;  %v1174_v30 = vrot.slane %v920_v10, 2  ;;  %v1175_v61 = vrot.slane %v920_v10, 4  ;;  %v1176_v2 = vrot.slane %v920_v10, 6  ;;  %v1173_v16 = vrot.slane %v919_v62, 6 }
 0x2e6   :  { %1467 = vst [vmem:[#allocation1 + $0x3] ss:$4 sm:$0xff] %v1155_v17  ;;  %v1795_v6 = vperm.slane %v1611_v52, %v2421_v59 }
 0x2e8   :  { %v1617_v17 = vpop.permute.xlu2 %1616 }
 0x2e9   :  { %v1473_v24 = vld.sshfl [vmem:[#allocation1 + $0x20] sm:$0xff pattern:$0x73625140]  ;;  %v1799_v56 = vperm.slane %v1617_v17, %v2439_v53 }
 0x2ea   :  { %1478 = vst [vmem:[#allocation1 + $0x20] ss:$4 sm:$0xff] %v916_v55 }
 0x2eb   :  { %1676 = vperm.xlu1 %1965, %v1473_v24   ;;  %1479 = vst [vmem:[#allocation1 + $0x21] ss:$4 sm:$0xff] %v1162_v8  ;;  %v1794_v8 = vsel %vm1705_vm2, %v1793_v22, %v2619_v31 }
 0x2ec   :  { %1480 = vst [vmem:[#allocation1 + $0x22] ss:$4 sm:$0xff] %v1163_v28  ;;  %v1796_v24 = vsel %vm1709_vm3, %v1795_v6, %v1794_v8 }
 0x2ed   :  { %v1472_v23 = vld.sshfl [vmem:[#allocation1] sm:$0xff pattern:$0x73625140]  ;;  %1481 = vst [vmem:[#allocation1 + $0x23] ss:$4 sm:$0xff] %v1164_v33 }
 0x2ee   :  { %1673 = vperm.xlu0 %1964, %v1472_v23   ;;  %1474 = vst [vmem:[#allocation1] ss:$4 sm:$0xff] %v915_v25 }
 0x2ef   :  { %1475 = vst [vmem:[#allocation1 + $0x1] ss:$4 sm:$0xff] %v1159_v36 }
 0x2f0   :  { %1476 = vst [vmem:[#allocation1 + $0x2] ss:$4 sm:$0xff] %v1160_v4  ;;  %v1626_v28 = vpop.permute.xlu2 %1625 }
 0x2f1   :  { %1477 = vst [vmem:[#allocation1 + $0x3] ss:$4 sm:$0xff] %v1161_v41 }
 0x2f2   :  { %v1614_v58 = vpop.permute.xlu1 %1613 }
 0x2f3   :  { %v1797_v25 = vperm.slane %v1614_v58, %v2424_v9 }
 0x2f4   :  { %v1483_v47 = vld.sshfl [vmem:[#allocation1 + $0x20] sm:$0xff pattern:$0x73625140] }
 0x2f5   :  { %1488 = vst [vmem:[#allocation1 + $0x20] ss:$4 sm:$0xff] %v918_v42  ;;  %v1798_v21 = vsel %vm1713_vm4, %v1797_v25, %v1796_v24 }
 0x2f6   :  { %1682 = vperm.xlu0 %1964, %v1483_v47   ;;  %1489 = vst [vmem:[#allocation1 + $0x21] ss:$4 sm:$0xff] %v1168_v3  ;;  %v1800_v4 = vsel %vm1717_vm5, %v1799_v56, %v1798_v21 }
 0x2f7   :  { %1490 = vst [vmem:[#allocation1 + $0x22] ss:$4 sm:$0xff] %v1169_v27 }
 0x2f8   :  { %v1482_v57 = vld.sshfl [vmem:[#allocation1] sm:$0xff pattern:$0x73625140]  ;;  %1491 = vst [vmem:[#allocation1 + $0x23] ss:$4 sm:$0xff] %v1170_v50  ;;  %v1635_v40 = vpop.permute.xlu2 %1634 }
 0x2f9   :  { %1679 = vperm.xlu2 %1966, %v1482_v57   ;;  %1484 = vst [vmem:[#allocation1] ss:$4 sm:$0xff] %v917_v43  ;;  %v1805_v43 = vperm.slane %v1626_v28, %v2470_v44  ;;  %v1811_v57 = vperm.slane %v1635_v40, %v2503_v35 }
 0x2fa   :  { %1485 = vst [vmem:[#allocation1 + $0x1] ss:$4 sm:$0xff] %v1165_v45  ;;  %v1623_v55 = vpop.permute.xlu1 %1622 }
 0x2fb   :  { %1486 = vst [vmem:[#allocation1 + $0x2] ss:$4 sm:$0xff] %v1166_v39  ;;  %v1803_v23 = vperm.slane %v1623_v55, %v2450_v11 }
 0x2fc   :  { %1487 = vst [vmem:[#allocation1 + $0x3] ss:$4 sm:$0xff] %v1167_v46 }
 0x2fd   :  { %v1620_v20 = vpop.permute.xlu0 %1619 }
 0x2fe   :  { %v1801_v33 = vperm.slane %v1620_v20, %v2453_v7 }
 0x2ff   :  { %v1493_v38 = vld.sshfl [vmem:[#allocation1 + $0x20] sm:$0xff pattern:$0x73625140] }
 0x300   :  { %1498 = vst [vmem:[#allocation1 + $0x20] ss:$4 sm:$0xff] %v920_v10  ;;  %v1802_v41 = vsel %vm1721_vm6, %v1801_v33, %v1800_v4 }
 0x301   :  { %1688 = vperm.xlu2 %1966, %v1493_v38   ;;  %1499 = vst [vmem:[#allocation1 + $0x21] ss:$4 sm:$0xff] %v1174_v30  ;;  %v1804_v42 = vsel %vm1725_vm7, %v1803_v23, %v1802_v41 }
 0x302   :  { %1500 = vst [vmem:[#allocation1 + $0x22] ss:$4 sm:$0xff] %v1175_v61  ;;  %v1806_v47 = vsel %vm1729_vm8, %v1805_v43, %v1804_v42 }
 0x303   :  { %v1492_v54 = vld.sshfl [vmem:[#allocation1] sm:$0xff pattern:$0x73625140]  ;;  %1501 = vst [vmem:[#allocation1 + $0x23] ss:$4 sm:$0xff] %v1176_v2 }
 0x304   :  { %1685 = vperm.xlu1 %1965, %v1492_v54   ;;  %1494 = vst [vmem:[#allocation1] ss:$4 sm:$0xff] %v919_v62 }
 0x305   :  { %1495 = vst [vmem:[#allocation1 + $0x1] ss:$4 sm:$0xff] %v1171_v63  ;;  %v1629_v34 = vpop.permute.xlu0 %1628 }
 0x306   :  { %1496 = vst [vmem:[#allocation1 + $0x2] ss:$4 sm:$0xff] %v1172_v13  ;;  %v1807_v31 = vperm.slane %v1629_v34, %v2484_v1 }
 0x307   :  { %1497 = vst [vmem:[#allocation1 + $0x3] ss:$4 sm:$0xff] %v1173_v16 }
 0x308   :  { %v1808_v27 = vsel %vm1733_vm9, %v1807_v31, %v1806_v47 }
 0x30a   :  { %v1503_v15 = vld.sshfl [vmem:[#allocation1 + $0x20] sm:$0xff pattern:$0x73625140] }
 0x30c   :  { %1694 = vperm.xlu1 %1965, %v1503_v15  }
 0x30e   :  { %v1502_v0 = vld.sshfl [vmem:[#allocation1] sm:$0xff pattern:$0x73625140] }
 0x30f   :  { %1691 = vperm.xlu0 %1964, %v1502_v0  }
 0x311   :  { %v1644_v62 = vpop.permute.xlu2 %1643 }
 0x312   :  { %v1817_v26 = vperm.slane %v1644_v62, %v2528_v12 }
 0x313   :  { %v1632_v36 = vpop.permute.xlu1 %1631 }
 0x314   :  { %v1809_v3 = vperm.slane %v1632_v36, %v2481_v60 }
 0x316   :  { %v1810_v50 = vsel %vm1737_vm10, %v1809_v3, %v1808_v27 }
 0x317   :  { %v1812_v29 = vsel %vm1741_vm11, %v1811_v57, %v1810_v50 }
 0x319   :  { %v1653_v13 = vpop.permute.xlu2 %1652 }
 0x31a   :  { %v1822_v22 = vperm.slane %v1653_v13, %v2402_v49 }
 0x31b   :  { %v1641_v18 = vpop.permute.xlu1 %1640 }
 0x31c   :  { %v1815_v46 = vperm.slane %v1641_v18, %v2512_v48 }
 0x31e   :  { %v1638_v45 = vpop.permute.xlu0 %1637 }
 0x31f   :  { %v1813_v39 = vperm.slane %v1638_v45, %v2515_v37 }
 0x321   :  { %v1814_v10 = vsel %vm1745_vm12, %v1813_v39, %v1812_v29 }
 0x322   :  { %v1816_v30 = vsel %vm1749_vm13, %v1815_v46, %v1814_v10 }
 0x323   :  { %v1818_v2 = vsel %vm1753_vm14, %v1817_v26, %v1816_v30 }
 0x326   :  { %v1647_v38 = vpop.permute.xlu0 %1646 }
 0x327   :  { %v1819_v61 = vperm.slane %v1647_v38, %v2525_v19 }
 0x329   :  { %v1820_v58 = vsel %vm1757_vm15, %v1819_v61, %v1818_v2 }
 0x32a   :  { %v1853_v63 = vsel %vm1852_vm0, %v1820_v58, %v2537_v32 }
 0x332   :  { %v1662_v17 = vpop.permute.xlu2 %1661 }
 0x333   :  { %v1828_v56 = vperm.slane %v1662_v17, %v2424_v9 }
 0x334   :  { %v1650_v54 = vpop.permute.xlu1 %1649 }
 0x335   :  { %v1821_v20 = vperm.slane %v1650_v54, %v2397_v14 }
 0x337   :  { %v1823_v0 = vsel %vm1701_vm1, %v1822_v22, %v1821_v20  ;;  %vm1856_vm1 = vcmask 1041408  }
 0x33a   :  { %v1671_v8 = vpop.permute.xlu2 %1670 }
 0x33b   :  { %v1834_v4 = vperm.slane %v1671_v8, %v2450_v11 }
 0x33c   :  { %v1659_v16 = vpop.permute.xlu1 %1658 }
 0x33d   :  { %v1826_v25 = vperm.slane %v1659_v16, %v2421_v59 }
 0x33f   :  { %v1656_v52 = vpop.permute.xlu0 %1655 }
 0x340   :  { %v1824_v6 = vperm.slane %v1656_v52, %v2405_v51 }
 0x342   :  { %v1825_v32 = vsel %vm1705_vm2, %v1824_v6, %v1823_v0 }
 0x343   :  { %v1827_v21 = vsel %vm1709_vm3, %v1826_v25, %v1825_v32 }
 0x344   :  { %v1829_v51 = vsel %vm1713_vm4, %v1828_v56, %v1827_v21 }
 0x347   :  { %v1665_v55 = vpop.permute.xlu0 %1664 }
 0x348   :  { %v1830_v33 = vperm.slane %v1665_v55, %v2439_v53 }
 0x34a   :  { %v1831_v49 = vsel %vm1717_vm5, %v1830_v33, %v1829_v51 }
 0x353   :  { %v1680_v36 = vpop.permute.xlu2 %1679 }
 0x354   :  { %v1840_v43 = vperm.slane %v1680_v36, %v2481_v60 }
 0x355   :  { %v1668_v15 = vpop.permute.xlu1 %1667 }
 0x356   :  { %v1832_v14 = vperm.slane %v1668_v15, %v2453_v7 }
 0x358   :  { %v1833_v59 = vsel %vm1721_vm6, %v1832_v14, %v1831_v49 }
 0x359   :  { %v1835_v34 = vsel %vm1725_vm7, %v1834_v4, %v1833_v59 }
 0x35b   :  { %v1689_v40 = vpop.permute.xlu2 %1688 }
 0x35d   :  { %v1677_v28 = vpop.permute.xlu1 %1676 }
 0x35e   :  { %v1838_v53 = vperm.slane %v1677_v28, %v2484_v1  ;;  %v1846_v1 = vperm.slane %v1689_v40, %v2512_v48 }
 0x360   :  { %v1674_v24 = vpop.permute.xlu0 %1673 }
 0x361   :  { %v1836_v23 = vperm.slane %v1674_v24, %v2470_v44 }
 0x363   :  { %v1837_v9 = vsel %vm1729_vm8, %v1836_v23, %v1835_v34 }
 0x364   :  { %v1839_v7 = vsel %vm1733_vm9, %v1838_v53, %v1837_v9 }
 0x365   :  { %v1841_v44 = vsel %vm1737_vm10, %v1840_v43, %v1839_v7 }
 0x368   :  { %v1683_v42 = vpop.permute.xlu0 %1682 }
 0x369   :  { %v1842_v31 = vperm.slane %v1683_v42, %v2503_v35 }
 0x36b   :  { %v1843_v47 = vsel %vm1741_vm11, %v1842_v31, %v1841_v44 }
 0x376   :  { %v1686_v41 = vpop.permute.xlu1 %1685 }
 0x377   :  { %v1844_v3 = vperm.slane %v1686_v41, %v2515_v37 }
 0x379   :  { %v1845_v27 = vsel %vm1745_vm12, %v1844_v3, %v1843_v47 }
 0x37a   :  { %v1847_v35 = vsel %vm1749_vm13, %v1846_v1, %v1845_v27 }
 0x37e   :  { %v1695_v11 = vpop.permute.xlu1 %1694 }
 0x37f   :  { %v1850_v18 = vperm.slane %v1695_v11, %v2525_v19 }
 0x381   :  { %v1692_v50 = vpop.permute.xlu0 %1691 }
 0x382   :  { %v1848_v45 = vperm.slane %v1692_v50, %v2528_v12 }
 0x384   :  { %v1849_v60 = vsel %vm1753_vm14, %v1848_v45, %v1847_v35 }
 0x385   :  { %v1851_v37 = vsel %vm1757_vm15, %v1850_v18, %v1849_v60 }
 0x386   :  { %v1854_v48 = vsel %vm1852_vm0, %v1851_v37, %v2611_v5 }
 0x387   :  { %v1855_v57 = vrot.slane %v1854_v48, 6 }
 0x389   :  { %v1857_v19 = vsel %vm1856_vm1, %v1853_v63, %v1855_v57 }
 0x38a   :  { %1859 = vst [vmem:[#allocation6] sm:$0xf] %v1857_v19 }
 0x38b   :  { %1870 = dma.vmem_to_hbm [thread:$0]  %s1866_s18, 64, %s1868_s21, [#allocation5]  }
 0x38c   :  { %2018 = dma.done.wait [#allocation5], 64  }
 0x38d   :  { %2019 = vsyncadd [#allocation5], 4294967232 }
 0x38e   :  { %1875 = vsyncpa [#allocation4], 1 }
 0x38f   :  { %1876 = vsyncpa [#allocation5], 1 }

</bundles_post_ra>
